<compile_context>
chip_gen: v7x
topology: tpu7x:2x2x1
jax: 0.10.0
libtpu: 0.0.40
codegen_flags: <defaults>
</compile_context>

<pallas_src>
import jax
import jax.numpy as jnp
from jax.experimental import pallas as pl
from jax.experimental.pallas import tpu as pltpu

# ---- static model configuration (matches CNN(seq_len=200, num_classes=4)) ----
SEQ_LEN = 200
NUM_CLASSES = 4
BATCH = 2
K = 100                      # conv1 kernel size
POOL = 10                    # MaxPool1d window / stride
C1 = 32                      # conv1 out channels
L = SEQ_LEN - K + 1          # conv output length (101)
P = L // POOL                # pooled length (10, floor like MaxPool1d)
NWIN = P * POOL              # conv positions actually consumed by the pool (100)
FLAT = C1 * P                # flattened feature size (320)
H1, H2, H3 = 128, 64, 32     # MLP widths
BN_EPS = 1e-5

KPAD = 128                   # conv taps zero-padded to a full lane width
LPAD = 256                   # per-sample row padded to a lane multiple (>= NWIN-1 + KPAD)
NBITS = 7                    # 2**7 = 128 > NWIN-1 (max per-row shift)


# ------------------------- fused Pallas kernel -------------------------

def cnn_fused_kernel(xs_ref, wT_ref, cba_ref, w1_ref, w2_ref, w3_ref, wm_ref,
                     mb_ref, logits_ref, feat_ref, flat_scr):
    # xs_ref:   (1, 1, LPAD)  one padded input row
    # wT_ref:   (KPAD, C1)    conv weight, transposed + zero-padded taps
    # cba_ref:  (3, C1)       rows = [conv bias, BN scale, BN shift]
    # w1_ref:   (FLAT, H1)    fc1 weight with rows pre-permuted to time-major order
    # w2_ref:   (H1, H2), w3_ref: (H2, H3), wm_ref: (H3, NUM_CLASSES)
    # mb_ref:   (4, H1)       rows = [b1, b2(pad), b3(pad), bm(pad)]
    # flat_scr: (1, FLAT)     VMEM scratch for the pooled+flattened activation

    # ---- build the Hankel window matrix A[r, c] = x[r + c] (zero past the pad) ----
    # Row r is the input row shifted left by r: done with log2(NWIN) conditional
    # shifts instead of NWIN per-row slices or a wrapper-side gather.
    A = jnp.broadcast_to(xs_ref[0], (NWIN, LPAD))                       # (NWIN, LPAD)
    row = jax.lax.broadcasted_iota(jnp.int32, (NWIN, 1), 0)
    for b in range(NBITS):
        sh = 1 << b
        shifted = jnp.concatenate(
            [A[:, sh:], jnp.zeros((NWIN, sh), jnp.float32)], axis=1)
        A = jnp.where((row & sh) != 0, shifted, A)

    # ---- conv1 as a single MXU matmul + bias + ReLU + BatchNorm (inference form) ----
    win = A[:, :KPAD]                                                   # (NWIN, KPAD)
    y = jnp.dot(win, wT_ref[...], preferred_element_type=jnp.float32)   # (NWIN, C1)
    y = jnp.maximum(y + cba_ref[0:1, :], 0.0)                           # conv bias + ReLU
    y = y * cba_ref[1:2, :] + cba_ref[2:3, :]                           # BN scale/shift

    # ---- MaxPool1d(POOL) fused with the flatten (time-major: index t*C1 + c) ----
    for t in range(P):
        flat_scr[0:1, t * C1:(t + 1) * C1] = jnp.max(
            y[t * POOL:(t + 1) * POOL, :], axis=0, keepdims=True)

    # ---- MLP: all activations stay VMEM resident ----
    flat = flat_scr[...]                                                # (1, FLAT)
    h = jnp.maximum(
        jnp.dot(flat, w1_ref[...], preferred_element_type=jnp.float32)
        + mb_ref[0:1, :], 0.0)
    # TODO(synk): Dropout(0.5) is identity here (inference/eval mode); training-mode RNG mask not implemented.
    h = jnp.maximum(
        jnp.dot(h, w2_ref[...], preferred_element_type=jnp.float32)
        + mb_ref[1:2, :H2], 0.0)
    feat = jnp.maximum(
        jnp.dot(h, w3_ref[...], preferred_element_type=jnp.float32)
        + mb_ref[2:3, :H3], 0.0)
    logits = jnp.dot(feat, wm_ref[...], preferred_element_type=jnp.float32) \
        + mb_ref[3:4, :NUM_CLASSES]

    logits_ref[0] = logits.astype(logits_ref.dtype)
    feat_ref[0] = feat.astype(feat_ref.dtype)


# ------------------------- wrapper -------------------------

@jax.jit
def cnn_forward(x, params):
    # x: (N, 1, SEQ_LEN) float32 (PyTorch NCL layout)
    N = x.shape[0]
    xs = x[:, 0, :].astype(jnp.float32)                                 # (N, SEQ_LEN)
    xs_pad = jnp.pad(xs, ((0, 0), (0, LPAD - SEQ_LEN)))[:, None, :]     # (N, 1, LPAD)

    # conv weight transposed and zero-padded along the tap dim to 128 lanes
    wT_pad = jnp.zeros((KPAD, C1), jnp.float32).at[:K, :].set(params["conv_w"].T)

    scale = params["bn_gamma"] / jnp.sqrt(params["bn_var"] + BN_EPS)
    shift = params["bn_beta"] - params["bn_mean"] * scale
    cba = jnp.stack([params["conv_b"], scale, shift], axis=0)           # (3, C1)

    # fc1 rows permuted ONCE: PyTorch flatten index c*P + t  ->  kernel index t*C1 + c
    w1p = params["w1"].reshape(C1, P, H1).transpose(1, 0, 2).reshape(FLAT, H1)

    # consolidated MLP biases, zero-padded to 128 lanes
    mb = jnp.zeros((4, H1), jnp.float32)
    mb = mb.at[0, :H1].set(params["b1"])
    mb = mb.at[1, :H2].set(params["b2"])
    mb = mb.at[2, :H3].set(params["b3"])
    mb = mb.at[3, :NUM_CLASSES].set(params["bm"])

    flops = 2 * N * (NWIN * KPAD * C1 + FLAT * H1 + H1 * H2 + H2 * H3
                     + H3 * NUM_CLASSES)
    bytes_accessed = 4 * (N * (LPAD + NUM_CLASSES + H3)
                          + KPAD * C1 + 3 * C1 + FLAT * H1 + H1 * H2
                          + H2 * H3 + H3 * NUM_CLASSES + 4 * H1)

    logits3, feat3 = pl.pallas_call(
        cnn_fused_kernel,
        out_shape=(jax.ShapeDtypeStruct((N, 1, NUM_CLASSES), jnp.float32),
                   jax.ShapeDtypeStruct((N, 1, H3), jnp.float32)),
        grid=(N,),
        in_specs=[
            pl.BlockSpec((1, 1, LPAD), lambda n: (n, 0, 0)),            # per-sample row
            pl.BlockSpec((KPAD, C1), lambda n: (0, 0)),                 # conv weight
            pl.BlockSpec((3, C1), lambda n: (0, 0)),                    # conv bias / BN
            pl.BlockSpec((FLAT, H1), lambda n: (0, 0)),                 # fc1 (permuted)
            pl.BlockSpec((H1, H2), lambda n: (0, 0)),                   # fc2
            pl.BlockSpec((H2, H3), lambda n: (0, 0)),                   # fc3
            pl.BlockSpec((H3, NUM_CLASSES), lambda n: (0, 0)),          # fcm
            pl.BlockSpec((4, H1), lambda n: (0, 0)),                    # MLP biases
        ],
        out_specs=(pl.BlockSpec((1, 1, NUM_CLASSES), lambda n: (n, 0, 0)),
                   pl.BlockSpec((1, 1, H3), lambda n: (n, 0, 0))),
        scratch_shapes=[pltpu.VMEM((1, FLAT), jnp.float32)],
        compiler_params=pltpu.CompilerParams(dimension_semantics=("parallel",)),
        cost_estimate=pl.CostEstimate(flops=flops, transcendentals=0,
                                      bytes_accessed=bytes_accessed),
    )(xs_pad, wT_pad, cba, w1p, params["w2"], params["w3"], params["wm"], mb)

    return logits3[:, 0, :], feat3[:, 0, :]


# ------------------------- deterministic parameter init -------------------------

def init_params(key):
    ks = jax.random.split(key, 10)

    def u(k, shape, fan_in):
        bound = 1.0 / jnp.sqrt(jnp.float32(fan_in))
        return jax.random.uniform(k, shape, jnp.float32, -bound, bound)

    return dict(
        conv_w=u(ks[0], (C1, K), K),                      # Conv1d(1, 32, 100) weight (out, k)
        conv_b=u(ks[1], (C1,), K),
        bn_gamma=jnp.ones((C1,), jnp.float32),            # BatchNorm1d defaults
        bn_beta=jnp.zeros((C1,), jnp.float32),
        bn_mean=jnp.zeros((C1,), jnp.float32),
        bn_var=jnp.ones((C1,), jnp.float32),
        w1=u(ks[2], (FLAT, H1), FLAT), b1=u(ks[3], (H1,), FLAT),
        w2=u(ks[4], (H1, H2), H1),     b2=u(ks[5], (H2,), H1),
        w3=u(ks[6], (H2, H3), H2),     b3=u(ks[7], (H3,), H2),
        wm=u(ks[8], (H3, NUM_CLASSES), H3), bm=u(ks[9], (NUM_CLASSES,), H3),
    )


# ------------------------- pure-JAX reference -------------------------

def reference_forward(x, params):
    N = x.shape[0]
    xs = x[:, 0, :]
    cols = xs[:, jnp.arange(L)[:, None] + jnp.arange(K)[None, :]]     # (N, L, K)
    y = cols @ params["conv_w"].T + params["conv_b"]
    y = jnp.maximum(y, 0.0)
    scale = params["bn_gamma"] / jnp.sqrt(params["bn_var"] + BN_EPS)
    y = y * scale + (params["bn_beta"] - params["bn_mean"] * scale)
    y = y[:, :P * POOL, :].reshape(N, P, POOL, C1).max(axis=2)        # (N, P, C1)
    flat = jnp.transpose(y, (0, 2, 1)).reshape(N, FLAT)               # channel-major
    h = jnp.maximum(flat @ params["w1"] + params["b1"], 0.0)
    h = jnp.maximum(h @ params["w2"] + params["b2"], 0.0)
    feat = jnp.maximum(h @ params["w3"] + params["b3"], 0.0)
    logits = feat @ params["wm"] + params["bm"]
    return logits, feat


if __name__ == "__main__":
    key = jax.random.PRNGKey(0)
    pkey, xkey = jax.random.split(key)
    params = init_params(pkey)
    x = jax.random.normal(xkey, (BATCH, 1, SEQ_LEN), jnp.float32)

    logits, feat = cnn_forward(x, params)
    jax.block_until_ready((logits, feat))

    ref_logits, ref_feat = reference_forward(x, params)
    assert logits.shape == (BATCH, NUM_CLASSES) and feat.shape == (BATCH, H3)
    assert jnp.allclose(logits, ref_logits, atol=1e-3, rtol=1e-3)
    assert jnp.allclose(feat, ref_feat, atol=1e-3, rtol=1e-3)

    print("KERNEL_OK")
</pallas_src>

<mosaic_0001>
module attributes {stable_mosaic.version = 11 : i64} {
  func.func @cnn_fused_kernel(%arg0: i32, %arg1: memref<1x1x256xf32, #tpu.memory_space<vmem>>, %arg2: memref<128x32xf32, #tpu.memory_space<vmem>>, %arg3: memref<3x32xf32, #tpu.memory_space<vmem>>, %arg4: memref<320x128xf32, #tpu.memory_space<vmem>>, %arg5: memref<128x64xf32, #tpu.memory_space<vmem>>, %arg6: memref<64x32xf32, #tpu.memory_space<vmem>>, %arg7: memref<32x4xf32, #tpu.memory_space<vmem>>, %arg8: memref<4x128xf32, #tpu.memory_space<vmem>>, %arg9: memref<1x1x4xf32, #tpu.memory_space<vmem>>, %arg10: memref<1x1x32xf32, #tpu.memory_space<vmem>>, %arg11: memref<1x320xf32, #tpu.memory_space<vmem>>) attributes {dimension_semantics = [#tpu.dimension_semantics<parallel>], iteration_bounds = array<i64: 2>, scalar_prefetch = 0 : i64, scratch_operands = 1 : i64, tpu.core_type = #tpu.core_type<tc>, window_params = [{transform_indices = @transform_0, window_bounds = array<i64: 1, 1, 256>}, {pipeline_mode = #tpu.pipeline_mode<synchronous>, transform_indices = @transform_1, window_bounds = array<i64: 128, 32>}, {pipeline_mode = #tpu.pipeline_mode<synchronous>, transform_indices = @transform_2, window_bounds = array<i64: 3, 32>}, {pipeline_mode = #tpu.pipeline_mode<synchronous>, transform_indices = @transform_3, window_bounds = array<i64: 320, 128>}, {pipeline_mode = #tpu.pipeline_mode<synchronous>, transform_indices = @transform_4, window_bounds = array<i64: 128, 64>}, {pipeline_mode = #tpu.pipeline_mode<synchronous>, transform_indices = @transform_5, window_bounds = array<i64: 64, 32>}, {pipeline_mode = #tpu.pipeline_mode<synchronous>, transform_indices = @transform_6, window_bounds = array<i64: 32, 4>}, {pipeline_mode = #tpu.pipeline_mode<synchronous>, transform_indices = @transform_7, window_bounds = array<i64: 4, 128>}, {transform_indices = @transform_8, window_bounds = array<i64: 1, 1, 4>}, {transform_indices = @transform_9, window_bounds = array<i64: 1, 1, 32>}]} {
    %c0 = arith.constant 0 : index
    %c0_0 = arith.constant 0 : index
    %c0_1 = arith.constant 0 : index
    %0 = vector.load %arg1[%c0, %c0_0, %c0_1] : memref<1x1x256xf32, #tpu.memory_space<vmem>>, vector<1x1x256xf32>
    %1 = vector.shape_cast %0 : vector<1x1x256xf32> to vector<1x256xf32>
    %2 = vector.shape_cast %1 : vector<1x256xf32> to vector<1x256xf32>
    %3 = vector.broadcast %2 : vector<1x256xf32> to vector<100x256xf32>
    %4 = tpu.iota {dimensions = array<i32: 0>} : vector<100x1xi32>
    %5 = vector.extract_strided_slice %3 {offsets = [0, 1], sizes = [100, 255], strides = [1, 1]} : vector<100x256xf32> to vector<100x255xf32>
    %cst = arith.constant 0.000000e+00 : f32
    %6 = vector.broadcast %cst : f32 to vector<100x1xf32>
    %7 = tpu.concatenate %5, %6 in 1 : vector<100x255xf32>, vector<100x1xf32> -> vector<100x256xf32>
    %c1_i32 = arith.constant 1 : i32
    %8 = vector.broadcast %c1_i32 : i32 to vector<100x1xi32>
    %9 = arith.andi %4, %8 : vector<100x1xi32>
    %c0_i32 = arith.constant 0 : i32
    %10 = vector.broadcast %c0_i32 : i32 to vector<100x1xi32>
    %11 = arith.cmpi ne, %9, %10 : vector<100x1xi32>
    %12 = vector.shape_cast %11 : vector<100x1xi1> to vector<100x1xi1>
    %13 = vector.broadcast %12 : vector<100x1xi1> to vector<100x256xi1>
    %14 = arith.select %13, %7, %3 : vector<100x256xi1>, vector<100x256xf32>
    %15 = vector.extract_strided_slice %14 {offsets = [0, 2], sizes = [100, 254], strides = [1, 1]} : vector<100x256xf32> to vector<100x254xf32>
    %cst_2 = arith.constant 0.000000e+00 : f32
    %16 = vector.broadcast %cst_2 : f32 to vector<100x2xf32>
    %17 = tpu.concatenate %15, %16 in 1 : vector<100x254xf32>, vector<100x2xf32> -> vector<100x256xf32>
    %c2_i32 = arith.constant 2 : i32
    %18 = vector.broadcast %c2_i32 : i32 to vector<100x1xi32>
    %19 = arith.andi %4, %18 : vector<100x1xi32>
    %c0_i32_3 = arith.constant 0 : i32
    %20 = vector.broadcast %c0_i32_3 : i32 to vector<100x1xi32>
    %21 = arith.cmpi ne, %19, %20 : vector<100x1xi32>
    %22 = vector.shape_cast %21 : vector<100x1xi1> to vector<100x1xi1>
    %23 = vector.broadcast %22 : vector<100x1xi1> to vector<100x256xi1>
    %24 = arith.select %23, %17, %14 : vector<100x256xi1>, vector<100x256xf32>
    %25 = vector.extract_strided_slice %24 {offsets = [0, 4], sizes = [100, 252], strides = [1, 1]} : vector<100x256xf32> to vector<100x252xf32>
    %cst_4 = arith.constant 0.000000e+00 : f32
    %26 = vector.broadcast %cst_4 : f32 to vector<100x4xf32>
    %27 = tpu.concatenate %25, %26 in 1 : vector<100x252xf32>, vector<100x4xf32> -> vector<100x256xf32>
    %c4_i32 = arith.constant 4 : i32
    %28 = vector.broadcast %c4_i32 : i32 to vector<100x1xi32>
    %29 = arith.andi %4, %28 : vector<100x1xi32>
    %c0_i32_5 = arith.constant 0 : i32
    %30 = vector.broadcast %c0_i32_5 : i32 to vector<100x1xi32>
    %31 = arith.cmpi ne, %29, %30 : vector<100x1xi32>
    %32 = vector.shape_cast %31 : vector<100x1xi1> to vector<100x1xi1>
    %33 = vector.broadcast %32 : vector<100x1xi1> to vector<100x256xi1>
    %34 = arith.select %33, %27, %24 : vector<100x256xi1>, vector<100x256xf32>
    %35 = vector.extract_strided_slice %34 {offsets = [0, 8], sizes = [100, 248], strides = [1, 1]} : vector<100x256xf32> to vector<100x248xf32>
    %cst_6 = arith.constant 0.000000e+00 : f32
    %36 = vector.broadcast %cst_6 : f32 to vector<100x8xf32>
    %37 = tpu.concatenate %35, %36 in 1 : vector<100x248xf32>, vector<100x8xf32> -> vector<100x256xf32>
    %c8_i32 = arith.constant 8 : i32
    %38 = vector.broadcast %c8_i32 : i32 to vector<100x1xi32>
    %39 = arith.andi %4, %38 : vector<100x1xi32>
    %c0_i32_7 = arith.constant 0 : i32
    %40 = vector.broadcast %c0_i32_7 : i32 to vector<100x1xi32>
    %41 = arith.cmpi ne, %39, %40 : vector<100x1xi32>
    %42 = vector.shape_cast %41 : vector<100x1xi1> to vector<100x1xi1>
    %43 = vector.broadcast %42 : vector<100x1xi1> to vector<100x256xi1>
    %44 = arith.select %43, %37, %34 : vector<100x256xi1>, vector<100x256xf32>
    %45 = vector.extract_strided_slice %44 {offsets = [0, 16], sizes = [100, 240], strides = [1, 1]} : vector<100x256xf32> to vector<100x240xf32>
    %cst_8 = arith.constant 0.000000e+00 : f32
    %46 = vector.broadcast %cst_8 : f32 to vector<100x16xf32>
    %47 = tpu.concatenate %45, %46 in 1 : vector<100x240xf32>, vector<100x16xf32> -> vector<100x256xf32>
    %c16_i32 = arith.constant 16 : i32
    %48 = vector.broadcast %c16_i32 : i32 to vector<100x1xi32>
    %49 = arith.andi %4, %48 : vector<100x1xi32>
    %c0_i32_9 = arith.constant 0 : i32
    %50 = vector.broadcast %c0_i32_9 : i32 to vector<100x1xi32>
    %51 = arith.cmpi ne, %49, %50 : vector<100x1xi32>
    %52 = vector.shape_cast %51 : vector<100x1xi1> to vector<100x1xi1>
    %53 = vector.broadcast %52 : vector<100x1xi1> to vector<100x256xi1>
    %54 = arith.select %53, %47, %44 : vector<100x256xi1>, vector<100x256xf32>
    %55 = vector.extract_strided_slice %54 {offsets = [0, 32], sizes = [100, 224], strides = [1, 1]} : vector<100x256xf32> to vector<100x224xf32>
    %cst_10 = arith.constant 0.000000e+00 : f32
    %56 = vector.broadcast %cst_10 : f32 to vector<100x32xf32>
    %57 = tpu.concatenate %55, %56 in 1 : vector<100x224xf32>, vector<100x32xf32> -> vector<100x256xf32>
    %c32_i32 = arith.constant 32 : i32
    %58 = vector.broadcast %c32_i32 : i32 to vector<100x1xi32>
    %59 = arith.andi %4, %58 : vector<100x1xi32>
    %c0_i32_11 = arith.constant 0 : i32
    %60 = vector.broadcast %c0_i32_11 : i32 to vector<100x1xi32>
    %61 = arith.cmpi ne, %59, %60 : vector<100x1xi32>
    %62 = vector.shape_cast %61 : vector<100x1xi1> to vector<100x1xi1>
    %63 = vector.broadcast %62 : vector<100x1xi1> to vector<100x256xi1>
    %64 = arith.select %63, %57, %54 : vector<100x256xi1>, vector<100x256xf32>
    %65 = vector.extract_strided_slice %64 {offsets = [0, 64], sizes = [100, 192], strides = [1, 1]} : vector<100x256xf32> to vector<100x192xf32>
    %cst_12 = arith.constant 0.000000e+00 : f32
    %66 = vector.broadcast %cst_12 : f32 to vector<100x64xf32>
    %67 = tpu.concatenate %65, %66 in 1 : vector<100x192xf32>, vector<100x64xf32> -> vector<100x256xf32>
    %c64_i32 = arith.constant 64 : i32
    %68 = vector.broadcast %c64_i32 : i32 to vector<100x1xi32>
    %69 = arith.andi %4, %68 : vector<100x1xi32>
    %c0_i32_13 = arith.constant 0 : i32
    %70 = vector.broadcast %c0_i32_13 : i32 to vector<100x1xi32>
    %71 = arith.cmpi ne, %69, %70 : vector<100x1xi32>
    %72 = vector.shape_cast %71 : vector<100x1xi1> to vector<100x1xi1>
    %73 = vector.broadcast %72 : vector<100x1xi1> to vector<100x256xi1>
    %74 = arith.select %73, %67, %64 : vector<100x256xi1>, vector<100x256xf32>
    %75 = vector.extract_strided_slice %74 {offsets = [0, 0], sizes = [100, 128], strides = [1, 1]} : vector<100x256xf32> to vector<100x128xf32>
    %c0_14 = arith.constant 0 : index
    %c0_15 = arith.constant 0 : index
    %76 = vector.load %arg2[%c0_14, %c0_15] : memref<128x32xf32, #tpu.memory_space<vmem>>, vector<128x32xf32>
    %cst_16 = arith.constant dense<0.000000e+00> : vector<100x32xf32>
    %77 = tpu.matmul %75, %76, %cst_16 {dimension_numbers = #tpu.dot_dimension_numbers<[1], [0], [0], [1], [0, 0, 1, 1], [], []>} : vector<100x128xf32>, vector<128x32xf32>, vector<100x32xf32> -> vector<100x32xf32>
    %c0_17 = arith.constant 0 : index
    %c0_18 = arith.constant 0 : index
    %78 = vector.load %arg3[%c0_17, %c0_18] : memref<3x32xf32, #tpu.memory_space<vmem>>, vector<1x32xf32>
    %79 = vector.broadcast %78 : vector<1x32xf32> to vector<100x32xf32>
    %80 = arith.addf %77, %79 : vector<100x32xf32>
    %cst_19 = arith.constant 0.000000e+00 : f32
    %81 = vector.broadcast %cst_19 : f32 to vector<100x32xf32>
    %82 = arith.maximumf %80, %81 : vector<100x32xf32>
    %c1 = arith.constant 1 : index
    %c0_20 = arith.constant 0 : index
    %83 = vector.load %arg3[%c1, %c0_20] : memref<3x32xf32, #tpu.memory_space<vmem>>, vector<1x32xf32>
    %84 = vector.broadcast %83 : vector<1x32xf32> to vector<100x32xf32>
    %85 = arith.mulf %82, %84 : vector<100x32xf32>
    %c2 = arith.constant 2 : index
    %c0_21 = arith.constant 0 : index
    %86 = vector.load %arg3[%c2, %c0_21] : memref<3x32xf32, #tpu.memory_space<vmem>>, vector<1x32xf32>
    %87 = vector.broadcast %86 : vector<1x32xf32> to vector<100x32xf32>
    %88 = arith.addf %85, %87 : vector<100x32xf32>
    %89 = vector.extract_strided_slice %88 {offsets = [0, 0], sizes = [10, 32], strides = [1, 1]} : vector<100x32xf32> to vector<10x32xf32>
    %cst_22 = arith.constant dense<0xFF800000> : vector<32xf32>
    %90 = vector.multi_reduction <maximumf>, %89, %cst_22 [0] : vector<10x32xf32> to vector<32xf32>
    %91 = vector.shape_cast %90 : vector<32xf32> to vector<1x32xf32>
    %c0_23 = arith.constant 0 : index
    %c0_24 = arith.constant 0 : index
    %92 = vector.load %arg11[%c0_23, %c0_24] : memref<1x320xf32, #tpu.memory_space<vmem>>, vector<1x32xf32>
    tpu.vector_store %arg11[%c0_23, %c0_24], %91 {strides = array<i32>} : memref<1x320xf32, #tpu.memory_space<vmem>>, vector<1x32xf32>,
    %93 = vector.extract_strided_slice %88 {offsets = [10, 0], sizes = [10, 32], strides = [1, 1]} : vector<100x32xf32> to vector<10x32xf32>
    %cst_25 = arith.constant dense<0xFF800000> : vector<32xf32>
    %94 = vector.multi_reduction <maximumf>, %93, %cst_25 [0] : vector<10x32xf32> to vector<32xf32>
    %95 = vector.shape_cast %94 : vector<32xf32> to vector<1x32xf32>
    %c0_26 = arith.constant 0 : index
    %c32 = arith.constant 32 : index
    %96 = vector.load %arg11[%c0_26, %c32] : memref<1x320xf32, #tpu.memory_space<vmem>>, vector<1x32xf32>
    tpu.vector_store %arg11[%c0_26, %c32], %95 {strides = array<i32>} : memref<1x320xf32, #tpu.memory_space<vmem>>, vector<1x32xf32>,
    %97 = vector.extract_strided_slice %88 {offsets = [20, 0], sizes = [10, 32], strides = [1, 1]} : vector<100x32xf32> to vector<10x32xf32>
    %cst_27 = arith.constant dense<0xFF800000> : vector<32xf32>
    %98 = vector.multi_reduction <maximumf>, %97, %cst_27 [0] : vector<10x32xf32> to vector<32xf32>
    %99 = vector.shape_cast %98 : vector<32xf32> to vector<1x32xf32>
    %c0_28 = arith.constant 0 : index
    %c64 = arith.constant 64 : index
    %100 = vector.load %arg11[%c0_28, %c64] : memref<1x320xf32, #tpu.memory_space<vmem>>, vector<1x32xf32>
    tpu.vector_store %arg11[%c0_28, %c64], %99 {strides = array<i32>} : memref<1x320xf32, #tpu.memory_space<vmem>>, vector<1x32xf32>,
    %101 = vector.extract_strided_slice %88 {offsets = [30, 0], sizes = [10, 32], strides = [1, 1]} : vector<100x32xf32> to vector<10x32xf32>
    %cst_29 = arith.constant dense<0xFF800000> : vector<32xf32>
    %102 = vector.multi_reduction <maximumf>, %101, %cst_29 [0] : vector<10x32xf32> to vector<32xf32>
    %103 = vector.shape_cast %102 : vector<32xf32> to vector<1x32xf32>
    %c0_30 = arith.constant 0 : index
    %c96 = arith.constant 96 : index
    %104 = vector.load %arg11[%c0_30, %c96] : memref<1x320xf32, #tpu.memory_space<vmem>>, vector<1x32xf32>
    tpu.vector_store %arg11[%c0_30, %c96], %103 {strides = array<i32>} : memref<1x320xf32, #tpu.memory_space<vmem>>, vector<1x32xf32>,
    %105 = vector.extract_strided_slice %88 {offsets = [40, 0], sizes = [10, 32], strides = [1, 1]} : vector<100x32xf32> to vector<10x32xf32>
    %cst_31 = arith.constant dense<0xFF800000> : vector<32xf32>
    %106 = vector.multi_reduction <maximumf>, %105, %cst_31 [0] : vector<10x32xf32> to vector<32xf32>
    %107 = vector.shape_cast %106 : vector<32xf32> to vector<1x32xf32>
    %c0_32 = arith.constant 0 : index
    %c128 = arith.constant 128 : index
    %108 = vector.load %arg11[%c0_32, %c128] : memref<1x320xf32, #tpu.memory_space<vmem>>, vector<1x32xf32>
    tpu.vector_store %arg11[%c0_32, %c128], %107 {strides = array<i32>} : memref<1x320xf32, #tpu.memory_space<vmem>>, vector<1x32xf32>,
    %109 = vector.extract_strided_slice %88 {offsets = [50, 0], sizes = [10, 32], strides = [1, 1]} : vector<100x32xf32> to vector<10x32xf32>
    %cst_33 = arith.constant dense<0xFF800000> : vector<32xf32>
    %110 = vector.multi_reduction <maximumf>, %109, %cst_33 [0] : vector<10x32xf32> to vector<32xf32>
    %111 = vector.shape_cast %110 : vector<32xf32> to vector<1x32xf32>
    %c0_34 = arith.constant 0 : index
    %c160 = arith.constant 160 : index
    %112 = vector.load %arg11[%c0_34, %c160] : memref<1x320xf32, #tpu.memory_space<vmem>>, vector<1x32xf32>
    tpu.vector_store %arg11[%c0_34, %c160], %111 {strides = array<i32>} : memref<1x320xf32, #tpu.memory_space<vmem>>, vector<1x32xf32>,
    %113 = vector.extract_strided_slice %88 {offsets = [60, 0], sizes = [10, 32], strides = [1, 1]} : vector<100x32xf32> to vector<10x32xf32>
    %cst_35 = arith.constant dense<0xFF800000> : vector<32xf32>
    %114 = vector.multi_reduction <maximumf>, %113, %cst_35 [0] : vector<10x32xf32> to vector<32xf32>
    %115 = vector.shape_cast %114 : vector<32xf32> to vector<1x32xf32>
    %c0_36 = arith.constant 0 : index
    %c192 = arith.constant 192 : index
    %116 = vector.load %arg11[%c0_36, %c192] : memref<1x320xf32, #tpu.memory_space<vmem>>, vector<1x32xf32>
    tpu.vector_store %arg11[%c0_36, %c192], %115 {strides = array<i32>} : memref<1x320xf32, #tpu.memory_space<vmem>>, vector<1x32xf32>,
    %117 = vector.extract_strided_slice %88 {offsets = [70, 0], sizes = [10, 32], strides = [1, 1]} : vector<100x32xf32> to vector<10x32xf32>
    %cst_37 = arith.constant dense<0xFF800000> : vector<32xf32>
    %118 = vector.multi_reduction <maximumf>, %117, %cst_37 [0] : vector<10x32xf32> to vector<32xf32>
    %119 = vector.shape_cast %118 : vector<32xf32> to vector<1x32xf32>
    %c0_38 = arith.constant 0 : index
    %c224 = arith.constant 224 : index
    %120 = vector.load %arg11[%c0_38, %c224] : memref<1x320xf32, #tpu.memory_space<vmem>>, vector<1x32xf32>
    tpu.vector_store %arg11[%c0_38, %c224], %119 {strides = array<i32>} : memref<1x320xf32, #tpu.memory_space<vmem>>, vector<1x32xf32>,
    %121 = vector.extract_strided_slice %88 {offsets = [80, 0], sizes = [10, 32], strides = [1, 1]} : vector<100x32xf32> to vector<10x32xf32>
    %cst_39 = arith.constant dense<0xFF800000> : vector<32xf32>
    %122 = vector.multi_reduction <maximumf>, %121, %cst_39 [0] : vector<10x32xf32> to vector<32xf32>
    %123 = vector.shape_cast %122 : vector<32xf32> to vector<1x32xf32>
    %c0_40 = arith.constant 0 : index
    %c256 = arith.constant 256 : index
    %124 = vector.load %arg11[%c0_40, %c256] : memref<1x320xf32, #tpu.memory_space<vmem>>, vector<1x32xf32>
    tpu.vector_store %arg11[%c0_40, %c256], %123 {strides = array<i32>} : memref<1x320xf32, #tpu.memory_space<vmem>>, vector<1x32xf32>,
    %125 = vector.extract_strided_slice %88 {offsets = [90, 0], sizes = [10, 32], strides = [1, 1]} : vector<100x32xf32> to vector<10x32xf32>
    %cst_41 = arith.constant dense<0xFF800000> : vector<32xf32>
    %126 = vector.multi_reduction <maximumf>, %125, %cst_41 [0] : vector<10x32xf32> to vector<32xf32>
    %127 = vector.shape_cast %126 : vector<32xf32> to vector<1x32xf32>
    %c0_42 = arith.constant 0 : index
    %c288 = arith.constant 288 : index
    %128 = vector.load %arg11[%c0_42, %c288] : memref<1x320xf32, #tpu.memory_space<vmem>>, vector<1x32xf32>
    tpu.vector_store %arg11[%c0_42, %c288], %127 {strides = array<i32>} : memref<1x320xf32, #tpu.memory_space<vmem>>, vector<1x32xf32>,
    %c0_43 = arith.constant 0 : index
    %c0_44 = arith.constant 0 : index
    %129 = vector.load %arg11[%c0_43, %c0_44] : memref<1x320xf32, #tpu.memory_space<vmem>>, vector<1x320xf32>
    %c0_45 = arith.constant 0 : index
    %c0_46 = arith.constant 0 : index
    %130 = vector.load %arg4[%c0_45, %c0_46] : memref<320x128xf32, #tpu.memory_space<vmem>>, vector<320x128xf32>
    %cst_47 = arith.constant dense<0.000000e+00> : vector<1x128xf32>
    %131 = tpu.matmul %129, %130, %cst_47 {dimension_numbers = #tpu.dot_dimension_numbers<[1], [0], [0], [1], [0, 0, 1, 1], [], []>} : vector<1x320xf32>, vector<320x128xf32>, vector<1x128xf32> -> vector<1x128xf32>
    %c0_48 = arith.constant 0 : index
    %c0_49 = arith.constant 0 : index
    %132 = vector.load %arg8[%c0_48, %c0_49] : memref<4x128xf32, #tpu.memory_space<vmem>>, vector<1x128xf32>
    %133 = arith.addf %131, %132 : vector<1x128xf32>
    %cst_50 = arith.constant 0.000000e+00 : f32
    %134 = vector.broadcast %cst_50 : f32 to vector<1x128xf32>
    %135 = arith.maximumf %133, %134 : vector<1x128xf32>
    %c0_51 = arith.constant 0 : index
    %c0_52 = arith.constant 0 : index
    %136 = vector.load %arg5[%c0_51, %c0_52] : memref<128x64xf32, #tpu.memory_space<vmem>>, vector<128x64xf32>
    %cst_53 = arith.constant dense<0.000000e+00> : vector<1x64xf32>
    %137 = tpu.matmul %135, %136, %cst_53 {dimension_numbers = #tpu.dot_dimension_numbers<[1], [0], [0], [1], [0, 0, 1, 1], [], []>} : vector<1x128xf32>, vector<128x64xf32>, vector<1x64xf32> -> vector<1x64xf32>
    %c1_54 = arith.constant 1 : index
    %c0_55 = arith.constant 0 : index
    %138 = vector.load %arg8[%c1_54, %c0_55] : memref<4x128xf32, #tpu.memory_space<vmem>>, vector<1x64xf32>
    %139 = arith.addf %137, %138 : vector<1x64xf32>
    %cst_56 = arith.constant 0.000000e+00 : f32
    %140 = vector.broadcast %cst_56 : f32 to vector<1x64xf32>
    %141 = arith.maximumf %139, %140 : vector<1x64xf32>
    %c0_57 = arith.constant 0 : index
    %c0_58 = arith.constant 0 : index
    %142 = vector.load %arg6[%c0_57, %c0_58] : memref<64x32xf32, #tpu.memory_space<vmem>>, vector<64x32xf32>
    %cst_59 = arith.constant dense<0.000000e+00> : vector<1x32xf32>
    %143 = tpu.matmul %141, %142, %cst_59 {dimension_numbers = #tpu.dot_dimension_numbers<[1], [0], [0], [1], [0, 0, 1, 1], [], []>} : vector<1x64xf32>, vector<64x32xf32>, vector<1x32xf32> -> vector<1x32xf32>
    %c2_60 = arith.constant 2 : index
    %c0_61 = arith.constant 0 : index
    %144 = vector.load %arg8[%c2_60, %c0_61] : memref<4x128xf32, #tpu.memory_space<vmem>>, vector<1x32xf32>
    %145 = arith.addf %143, %144 : vector<1x32xf32>
    %cst_62 = arith.constant 0.000000e+00 : f32
    %146 = vector.broadcast %cst_62 : f32 to vector<1x32xf32>
    %147 = arith.maximumf %145, %146 : vector<1x32xf32>
    %c0_63 = arith.constant 0 : index
    %c0_64 = arith.constant 0 : index
    %148 = vector.load %arg7[%c0_63, %c0_64] : memref<32x4xf32, #tpu.memory_space<vmem>>, vector<32x4xf32>
    %cst_65 = arith.constant dense<0.000000e+00> : vector<1x4xf32>
    %149 = tpu.matmul %147, %148, %cst_65 {dimension_numbers = #tpu.dot_dimension_numbers<[1], [0], [0], [1], [0, 0, 1, 1], [], []>} : vector<1x32xf32>, vector<32x4xf32>, vector<1x4xf32> -> vector<1x4xf32>
    %c3 = arith.constant 3 : index
    %c0_66 = arith.constant 0 : index
    %150 = vector.load %arg8[%c3, %c0_66] : memref<4x128xf32, #tpu.memory_space<vmem>>, vector<1x4xf32>
    %151 = arith.addf %149, %150 : vector<1x4xf32>
    %c0_67 = arith.constant 0 : index
    %c0_68 = arith.constant 0 : index
    %c0_69 = arith.constant 0 : index
    %152 = vector.load %arg9[%c0_67, %c0_68, %c0_69] : memref<1x1x4xf32, #tpu.memory_space<vmem>>, vector<1x1x4xf32>
    %153 = vector.shape_cast %152 : vector<1x1x4xf32> to vector<1x4xf32>
    %154 = vector.shape_cast %151 : vector<1x4xf32> to vector<1x1x4xf32>
    tpu.vector_store %arg9[%c0_67, %c0_68, %c0_69], %154 {strides = array<i32>} : memref<1x1x4xf32, #tpu.memory_space<vmem>>, vector<1x1x4xf32>,
    %c0_70 = arith.constant 0 : index
    %c0_71 = arith.constant 0 : index
    %c0_72 = arith.constant 0 : index
    %155 = vector.load %arg10[%c0_70, %c0_71, %c0_72] : memref<1x1x32xf32, #tpu.memory_space<vmem>>, vector<1x1x32xf32>
    %156 = vector.shape_cast %155 : vector<1x1x32xf32> to vector<1x32xf32>
    %157 = vector.shape_cast %147 : vector<1x32xf32> to vector<1x1x32xf32>
    tpu.vector_store %arg10[%c0_70, %c0_71, %c0_72], %157 {strides = array<i32>} : memref<1x1x32xf32, #tpu.memory_space<vmem>>, vector<1x1x32xf32>,
    return
  }
  func.func @transform_0(%arg0: i32) -> (i32, i32, i32) {
    %c0_i32 = arith.constant 0 : i32
    %c0_i32_0 = arith.constant 0 : i32
    %c0_i32_1 = arith.constant 0 : i32
    return %arg0, %c0_i32, %c0_i32_0 : i32, i32, i32
  }
  func.func @transform_1(%arg0: i32) -> (i32, i32) {
    %c0_i32 = arith.constant 0 : i32
    %c0_i32_0 = arith.constant 0 : i32
    %c0_i32_1 = arith.constant 0 : i32
    return %c0_i32, %c0_i32_0 : i32, i32
  }
  func.func @transform_2(%arg0: i32) -> (i32, i32) {
    %c0_i32 = arith.constant 0 : i32
    %c0_i32_0 = arith.constant 0 : i32
    %c0_i32_1 = arith.constant 0 : i32
    return %c0_i32, %c0_i32_0 : i32, i32
  }
  func.func @transform_3(%arg0: i32) -> (i32, i32) {
    %c0_i32 = arith.constant 0 : i32
    %c0_i32_0 = arith.constant 0 : i32
    %c0_i32_1 = arith.constant 0 : i32
    return %c0_i32, %c0_i32_0 : i32, i32
  }
  func.func @transform_4(%arg0: i32) -> (i32, i32) {
    %c0_i32 = arith.constant 0 : i32
    %c0_i32_0 = arith.constant 0 : i32
    %c0_i32_1 = arith.constant 0 : i32
    return %c0_i32, %c0_i32_0 : i32, i32
  }
  func.func @transform_5(%arg0: i32) -> (i32, i32) {
    %c0_i32 = arith.constant 0 : i32
    %c0_i32_0 = arith.constant 0 : i32
    %c0_i32_1 = arith.constant 0 : i32
    return %c0_i32, %c0_i32_0 : i32, i32
  }
  func.func @transform_6(%arg0: i32) -> (i32, i32) {
    %c0_i32 = arith.constant 0 : i32
    %c0_i32_0 = arith.constant 0 : i32
    %c0_i32_1 = arith.constant 0 : i32
    return %c0_i32, %c0_i32_0 : i32, i32
  }
  func.func @transform_7(%arg0: i32) -> (i32, i32) {
    %c0_i32 = arith.constant 0 : i32
    %c0_i32_0 = arith.constant 0 : i32
    %c0_i32_1 = arith.constant 0 : i32
    return %c0_i32, %c0_i32_0 : i32, i32
  }
  func.func @transform_8(%arg0: i32) -> (i32, i32, i32) {
    %c0_i32 = arith.constant 0 : i32
    %c0_i32_0 = arith.constant 0 : i32
    %c0_i32_1 = arith.constant 0 : i32
    return %arg0, %c0_i32, %c0_i32_0 : i32, i32, i32
  }
  func.func @transform_9(%arg0: i32) -> (i32, i32, i32) {
    %c0_i32 = arith.constant 0 : i32
    %c0_i32_0 = arith.constant 0 : i32
    %c0_i32_1 = arith.constant 0 : i32
    return %arg0, %c0_i32, %c0_i32_0 : i32, i32, i32
  }
}

</mosaic_0001>

<bundles_post_ra>
// kernel: cnn_forward.1
= control target key start
LH: loop header
LB: loop body
LE: loop exit
PB: predicated region body
PF: predicated region fallthrough
CT: control target
= control target key end

     0   :  { %15 = vsyncpa [#allocation4], 0  ;;  %s4772_s0 = inlined_call_operand.vmem [shape: f32[2,1,256], index: 0, kind: input, shape index: {}]   ;;  %s4773_s1 = inlined_call_operand.vmem [shape: f32[128,32], index: 1, kind: input, shape index: {}]   ;;  %s4774_s2 = inlined_call_operand.vmem [shape: f32[3,32], index: 2, kind: input, shape index: {}]   ;;  %s4775_s3 = inlined_call_operand.vmem [shape: f32[320,128], index: 3, kind: input, shape index: {}]   ;;  %s4776_s4 = inlined_call_operand.vmem [shape: f32[128,64], index: 4, kind: input, shape index: {}]   ;;  %s4777_s5 = inlined_call_operand.vmem [shape: f32[64,32], index: 5, kind: input, shape index: {}]   ;;  %s4778_s6 = inlined_call_operand.vmem [shape: f32[32,4], index: 6, kind: input, shape index: {}]   ;;  %s4779_s7 = inlined_call_operand.vmem [shape: f32[4,128], index: 7, kind: input, shape index: {}]   ;;  %s4780_s8 = inlined_call_operand.hbm [shape: f32[2,1,4], index: 8, kind: output, shape index: {0}]   ;;  %s4781_s9 = inlined_call_operand.hbm [shape: f32[2,1,32], index: 9, kind: output, shape index: {1}]  }
   0x1   :  { %17 = vsyncpa [#allocation4 + $0x1], 0 }
   0x2   :  { %18 = vsyncpa [#allocation6], 0 }
   0x3   :  { %20 = vsyncpa [#allocation6 + $0x1], 0  ;;  %s3522_s30 = smov 0   ;;  %s3524_s10 = smov 0  }
   0x4   :  { %s3526_s11 = smov 0   ;;  %s3528_s12 = smov 0  }
   0x5 LB: > { %s3543_s13 = sadd.s32 4294967295, %s3456_s12   ;;  %s2677_s14 = sadd.s32 4294967294, %s3456_s12   ;;  %s3456_s12 = sphi %s3528_s12, %s4843_s12   ;;  %s3452_s11 = sphi %s3526_s11, %s4842_s11   ;;  %s3448_s10 = sphi %s3524_s10, %s4841_s10   ;;  %s3444_s30 = sphi %s3522_s30, %s4840_s30  }
   0x6   : > { %s3547_s15 = sadd.s32 1, %s3456_s12   ;;  %s206_s16 = sadd.s32 1, %s3452_s11 }
   0x7   : > { %s203_s17 = ssub.s32 %s3456_s12, %s3547_s15  ;;  %p216_p0 = scmp.ne.s32.totalorder %s3452_s11, %s3448_s10 }
   0x8   : > { %p204_p1 = scmp.eq.s32.totalorder %s203_s17, 0  ;;  %p217_p2 = scmp.eq.s32.totalorder %s3543_s13, 1 }
   0x9   : > { %p222_p3 = scmp.ne.s32.totalorder %s3448_s10, %s3444_s30  ;;  %p223_p4 = scmp.eq.s32.totalorder %s2677_s14, 1 }
   0xa   : > { %s3558_s18 = scalar_select %p204_p1, %s3452_s11, %s206_s16  }
   0xb   : > { %p3560_p5 = por %p217_p2, %p216_p0  ;;  %p3564_p6 = por %p223_p4, %p222_p3 }
   0xc   : > { %p2680_p7 = scmp.ge.s32.totalorder %s3456_s12, 1  ;;  %p295_p8 = scmp.lt.s32.totalorder %s3456_s12, 3 }
   0xe   : > { %p296_p9 = pnand %p2680_p7, %p295_p8 }
   0xf   : > { %p333_p10 = scmp.lt.s32.totalorder (!%p296_p9), %s3543_s13, 1  ;;  %v339_v0 = vlaneseq (!%p296_p9)  ;;  %s3458_s26 = smov (!%p296_p9), 127   ;;  %vm367_vm0 = vcmask (!%p296_p9), 1039360   ;;  %vm528_vm7 = vcmask (!%p296_p9), 1031168  }
  0x10   : > { %299 = sbr.rel (%p296_p9) target bundleno = 2030 (0x7ee), region = 52  ;;  %s3459_s27 = smov (!%p296_p9), 126  }
  0x11   : > { %v3573_v1 = vshrl.u32 (!%p296_p9), %v339_v0, 7  ;;  %s3460_s28 = smov (!%p296_p9), 124   ;;  %s3461_s29 = smov (!%p296_p9), 120  }
  0x12   : > { %s3462_s24 = smov (!%p296_p9), 112   ;;  %s3466_s23 = smov (!%p296_p9), 96  }
  0x13   : > { %v341_v2 = vsub.s32 (!%p296_p9), 0, %v3573_v1  ;;  %v345_v3 = vsub.s32 (!%p296_p9), 1, %v3573_v1  ;;  %v3591_v8 = vadd.s32 (!%p296_p9), 88, %v3573_v1  ;;  %v3594_v9 = vadd.s32 (!%p296_p9), 56, %v3573_v1  ;;  %s3470_s16 = smov (!%p296_p9), [#allocation5]  }
  0x14   : > { %v3597_v10 = vadd.s32 (!%p296_p9), 40, %v3573_v1  ;;  %v3600_v11 = vadd.s32 (!%p296_p9), 24, %v3573_v1  ;;  %v3605_v14 = vadd.s32 (!%p296_p9), 48, %v3573_v1  ;;  %v3611_v21 = vadd.s32 (!%p296_p9), 72, %v3573_v1  ;;  %s3366_s17 = sshll.u32 (!%p296_p9), %s3470_s16, 4  ;;  %s3367_s17 = int_to_ptr.vmem [resolvable:$false] %s3366_s17 }
  0x15   : > { %v383_v12 = vand.u32 (!%p296_p9), 1, %v3591_v8  ;;  %v379_v13 = vand.u32 (!%p296_p9), 1, %v3594_v9  ;;  %v3673_v43 = vadd.s32 (!%p296_p9), 80, %v3573_v1  ;;  %v3676_v44 = vadd.s32 (!%p296_p9), 8, %v3573_v1 }
  0x16   : > { %v377_v15 = vand.u32 (!%p296_p9), 1, %v3597_v10  ;;  %v375_v16 = vand.u32 (!%p296_p9), 1, %v3600_v11  ;;  %v378_v20 = vand.u32 (!%p296_p9), 1, %v3605_v14  ;;  %v381_v34 = vand.u32 (!%p296_p9), 1, %v3611_v21 }
  0x17   : > { %s334_s21 = scalar_select %p333_p10, %s3543_s13, 1  ;;  %vm396_vm1 = vcmp.ne.s32.totalorder %v383_v12, 0  ;;  %vm392_vm2 = vcmp.ne.s32.totalorder %v379_v13, 0  ;;  %v588_v45 = vand.u32 2, %v3594_v9  ;;  %v592_v46 = vand.u32 2, %v3591_v8 }
  0x18   : > { %vm390_vm3 = vcmp.ne.s32.totalorder %v377_v15, 0  ;;  %vm388_vm4 = vcmp.ne.s32.totalorder %v375_v16, 0  ;;  %vm391_vm5 = vcmp.ne.s32.totalorder %v378_v20, 0  ;;  %vm394_vm6 = vcmp.ne.s32.totalorder %v381_v34, 0 }
  0x19   : > { %s2681_s22 = sshll.u32 %s334_s21, 1  ;;  %v3681_v47 = vadd.s32 96, %v3573_v1  ;;  %v382_v48 = vand.u32 1, %v3673_v43  ;;  %v373_v49 = vand.u32 1, %v3676_v44  ;;  %v3686_v50 = vadd.s32 16, %v3573_v1  ;;  %s3368_s21 = scalar_lea.vmem %s3367_s17, 32 }
  0x1a   : > { %s336_s25 = scalar_lea.vmem %s4772_s0, %s2681_s22  ;;  %vm3688_vm8 = vcmp.ne.s32.totalorder %v588_v45, 0  ;;  %vm3692_vm9 = vcmp.ne.s32.totalorder %v592_v46, 0  ;;  %v584_v62 = vand.u32 2, %v3600_v11  ;;  %v3707_v63 = vadd.s32 32, %v3573_v1  ;;  %s4690_s22 = sand.u32 1, %s3448_s10  }
  0x1b   : > { %v337_v4 = vld [vmem:[%s336_s25] sm:$0x3]  ;;  %v384_v55 = vand.u32 1, %v3681_v47  ;;  %vm3697_vm10 = vcmp.ne.s32.totalorder %v382_v48, 0  ;;  %vm3701_vm11 = vcmp.ne.s32.totalorder %v373_v49, 0  ;;  %s2569_s14 = scalar_lea.sflag [#allocation6], %s4690_s22 }
  0x1c   : > { %v3582_v5 = vrot.slane %v337_v4, %v341_v2  ;;  %v3586_v6 = vrot.slane %v337_v4, %v345_v3  ;;  %vm597_vm13 = vcmp.ne.s32.totalorder %v584_v62, 0  ;;  %v376_v53 = vand.u32 1, %v3707_v63 }
  0x1d   : > { %vm3729_vm12 = vcmp.ne.s32.totalorder %v384_v55, 0 }
  0x1e   : > { %v3117_v7 = vpack.i.bf16 %v3586_v6, %v3582_v5 }
  0x20   : > { %3118 = vrot.lane.b32.xlu0 %v3117_v7, %s3458_s26 }
  0x92   : > { %v3119_v17 = vpop.permute.xlu0 %3118 }
  0x93   : > { %v3121_v18 = vunpack.i.h.bf16 %v3119_v17  ;;  %v3120_v19 = vunpack.i.l.bf16 %v3119_v17 }
  0x95   : > { %v3613_v22 = vsel %vm367_vm0, %v3121_v18, 0.0  ;;  %v3615_v23 = vsel %vm367_vm0, %v3120_v19, %v3121_v18  ;;  %vm389_vm0 = vcmp.ne.s32.totalorder %v376_v53, 0 }
  0x96   : > { %v446_v24 = vsel %vm396_vm1, %v3615_v23, %v3582_v5  ;;  %v447_v25 = vsel %vm396_vm1, %v3613_v22, %v3586_v6  ;;  %v438_v26 = vsel %vm392_vm2, %v3615_v23, %v3582_v5  ;;  %v439_v27 = vsel %vm392_vm2, %v3613_v22, %v3586_v6 }
  0x97   : > { %v3127_v28 = vpack.i.bf16 %v447_v25, %v446_v24  ;;  %v3122_v29 = vpack.i.bf16 %v439_v27, %v438_v26  ;;  %v3627_v30 = vsel %vm390_vm3, %v3615_v23, %v3582_v5  ;;  %v3631_v31 = vsel %vm390_vm3, %v3613_v22, %v3586_v6 }
  0x98   : > { %v3635_v32 = vsel %vm388_vm4, %v3615_v23, %v3582_v5  ;;  %v3639_v33 = vsel %vm388_vm4, %v3613_v22, %v3586_v6  ;;  %v3137_v35 = vpack.i.bf16 %v3631_v31, %v3627_v30  ;;  %v3650_v37 = vsel %vm391_vm5, %v3615_v23, %v3582_v5 }
  0x99   : > { %3128 = vrot.lane.b32.xlu1 %v3127_v28, %s3459_s27  ;;  %3123 = vrot.lane.b32.xlu0 %v3122_v29, %s3459_s27  ;;  %v3132_v36 = vpack.i.bf16 %v3639_v33, %v3635_v32  ;;  %v3654_v38 = vsel %vm391_vm5, %v3613_v22, %v3586_v6  ;;  %v3662_v40 = vsel %vm394_vm6, %v3615_v23, %v3582_v5  ;;  %vm737_vm4 = vcmask 1014784  }
  0x9a   : > { %v3142_v39 = vpack.i.bf16 %v3654_v38, %v3650_v37  ;;  %v3666_v41 = vsel %vm394_vm6, %v3613_v22, %v3586_v6  ;;  %v3776_v54 = vsel %vm3729_vm12, %v3615_v23, %v3582_v5  ;;  %v3782_v55 = vsel %vm3729_vm12, %v3613_v22, %v3586_v6 }
  0x9b   : > { %v3152_v42 = vpack.i.bf16 %v3666_v41, %v3662_v40  ;;  %v3167_v61 = vpack.i.bf16 %v3782_v55, %v3776_v54 }
  0x9d   : > { %3138 = vrot.lane.b32.xlu0 %v3137_v35, %s3459_s27  ;;  %3133 = vrot.lane.b32.xlu1 %v3132_v36, %s3459_s27  ;;  %v3748_v35 = vsel %vm3697_vm10, %v3613_v22, %v3586_v6  ;;  %v3754_v36 = vsel %vm3701_vm11, %v3615_v23, %v3582_v5 }
  0xa1   : > { %3143 = vrot.lane.b32.xlu1 %v3142_v39, %s3459_s27  ;;  %v3760_v39 = vsel %vm3701_vm11, %v3613_v22, %v3586_v6 }
  0xa5   : > { %3153 = vrot.lane.b32.xlu1 %v3152_v42, %s3459_s27  ;;  %v586_v42 = vand.u32 2, %v3597_v10 }
  0xa7   : > { %vm599_vm15 = vcmp.ne.s32.totalorder %v586_v42, 0 }
 0x10b   : > { %v3129_v51 = vpop.permute.xlu1 %3128  ;;  %v3124_v52 = vpop.permute.xlu0 %3123 }
 0x10c   : > { %v3131_v56 = vunpack.i.h.bf16 %v3129_v51  ;;  %v3130_v57 = vunpack.i.l.bf16 %v3129_v51  ;;  %v3126_v58 = vunpack.i.h.bf16 %v3124_v52  ;;  %v3125_v59 = vunpack.i.l.bf16 %v3124_v52 }
 0x10d   : > { %v3172_v52 = vpack.i.bf16 %v3760_v39, %v3754_v36 }
 0x10e   : > { %v579_v4 = vsel %vm528_vm7, %v3131_v56, 0.0  ;;  %v540_v7 = vsel %vm528_vm7, %v3130_v57, %v3131_v56  ;;  %v575_v12 = vsel %vm528_vm7, %v3126_v58, 0.0  ;;  %v536_v13 = vsel %vm528_vm7, %v3125_v59, %v3126_v58 }
 0x10f   : > { %v3134_v15 = vpop.permute.xlu1 %3133  ;;  %v3715_v16 = vsel %vm3688_vm8, %v536_v13, %v438_v26  ;;  %v3719_v17 = vsel %vm3688_vm8, %v575_v12, %v439_v27  ;;  %v3723_v18 = vsel %vm3692_vm9, %v540_v7, %v446_v24  ;;  %v3727_v19 = vsel %vm3692_vm9, %v579_v4, %v447_v25  ;;  %v3139_v20 = vpop.permute.xlu0 %3138 }
 0x110   : > { %v3136_v28 = vunpack.i.h.bf16 %v3134_v15  ;;  %v3135_v29 = vunpack.i.l.bf16 %v3134_v15  ;;  %v374_v26 = vand.u32 1, %v3686_v50  ;;  %v3147_v27 = vpack.i.bf16 %v3719_v17, %v3715_v16 }
 0x111   : > { %v3162_v24 = vpack.i.bf16 %v3727_v19, %v3723_v18  ;;  %v3742_v25 = vsel %vm3697_vm10, %v3615_v23, %v3582_v5  ;;  %v3141_v45 = vunpack.i.h.bf16 %v3139_v20  ;;  %v3140_v46 = vunpack.i.l.bf16 %v3139_v20 }
 0x112   : > { %v571_v48 = vsel %vm528_vm7, %v3136_v28, 0.0  ;;  %v532_v49 = vsel %vm528_vm7, %v3135_v29, %v3136_v28  ;;  %3148 = vrot.lane.b32.xlu0 %v3147_v27, %s3460_s28  ;;  %v3157_v51 = vpack.i.bf16 %v3748_v35, %v3742_v25  ;;  %vm387_vm14 = vcmp.ne.s32.totalorder %v374_v26, 0 }
 0x113   : > { %3163 = vrot.lane.b32.xlu1 %v3162_v24, %s3460_s28  ;;  %v3785_v56 = vsel %vm597_vm13, %v532_v49, %v3635_v32  ;;  %v3788_v57 = vsel %vm597_vm13, %v571_v48, %v3639_v33  ;;  %v573_v58 = vsel %vm528_vm7, %v3141_v45, 0.0  ;;  %v534_v59 = vsel %vm528_vm7, %v3140_v46, %v3141_v45  ;;  %v3144_v60 = vpop.permute.xlu1 %3143 }
 0x114   : > { %v3182_v32 = vpack.i.bf16 %v3788_v57, %v3785_v56  ;;  %v3799_v33 = vadd.s32 64, %v3573_v1  ;;  %v3803_v62 = vsel %vm387_vm14, %v3615_v23, %v3582_v5  ;;  %v3807_v4 = vsel %vm387_vm14, %v3613_v22, %v3586_v6 }
 0x115   : > { %v3810_v7 = vsel %vm599_vm15, %v534_v59, %v3627_v30  ;;  %v3813_v12 = vsel %vm599_vm15, %v573_v58, %v3631_v31  ;;  %v3146_v13 = vunpack.i.h.bf16 %v3144_v60  ;;  %v3145_v15 = vunpack.i.l.bf16 %v3144_v60 }
 0x116   : > { %3158 = vrot.lane.b32.xlu0 %v3157_v51, %s3459_s27  ;;  %v587_v20 = vand.u32 2, %v3605_v14  ;;  %v3177_v28 = vpack.i.bf16 %v3807_v4, %v3803_v62  ;;  %v3192_v29 = vpack.i.bf16 %v3813_v12, %v3810_v7  ;;  %v3824_v30 = vsel %vm389_vm0, %v3615_v23, %v3582_v5 }
 0x117   : > { %3173 = vrot.lane.b32.xlu1 %v3172_v52, %s3459_s27  ;;  %v3828_v31 = vsel %vm389_vm0, %v3613_v22, %v3586_v6  ;;  %v574_v34 = vsel %vm528_vm7, %v3146_v13, 0.0  ;;  %v535_v26 = vsel %vm528_vm7, %v3145_v15, %v3146_v13  ;;  %v380_v27 = vand.u32 1, %v3799_v33  ;;  %v3154_v51 = vpop.permute.xlu1 %3153 }
 0x118   : > { %vm600_vm1 = vcmp.ne.s32.totalorder %v587_v20, 0  ;;  %v3187_v24 = vpack.i.bf16 %v3828_v31, %v3824_v30  ;;  %v797_v52 = vand.u32 4, %v3594_v9  ;;  %v3156_v58 = vunpack.i.h.bf16 %v3154_v51 }
 0x119   : > { %v3838_v42 = vsel %vm600_vm1, %v535_v26, %v3650_v37  ;;  %v3841_v45 = vsel %vm600_vm1, %v574_v34, %v3654_v38  ;;  %vm393_vm2 = vcmp.ne.s32.totalorder %v380_v27, 0  ;;  %v372_v38 = vand.u32 1, %v3573_v1 }
 0x11a   : > { %3168 = vrot.lane.b32.xlu0 %v3167_v61, %s3459_s27  ;;  %v3197_v46 = vpack.i.bf16 %v3841_v45, %v3838_v42  ;;  %v3848_v48 = vsel %vm393_vm2, %v3615_v23, %v3582_v5  ;;  %v3852_v49 = vsel %vm393_vm2, %v3613_v22, %v3586_v6  ;;  %v3155_v59 = vunpack.i.l.bf16 %v3154_v51 }
 0x11b   : > { %3183 = vrot.lane.b32.xlu1 %v3182_v32, %s3460_s28  ;;  %v3207_v37 = vpack.i.bf16 %v3852_v49, %v3848_v48  ;;  %vm3860_vm3 = vcmp.ne.s32.totalorder %v372_v38, 0  ;;  %v590_v60 = vand.u32 2, %v3611_v21  ;;  %vm3865_vm5 = vcmp.ne.s32.totalorder %v797_v52, 0 }
 0x11c   : > { %v591_v15 = vand.u32 2, %v3673_v43  ;;  %v3874_v9 = vsel %vm3860_vm3, %v3615_v23, %v3582_v5  ;;  %v801_v34 = vand.u32 4, %v3591_v8  ;;  %v577_v26 = vsel %vm528_vm7, %v3156_v58, 0.0 }
 0x11d   : > { %v538_v27 = vsel %vm528_vm7, %v3155_v59, %v3156_v58  ;;  %vm3880_vm6 = vcmp.ne.s32.totalorder %v590_v60, 0  ;;  %v3901_v60 = vsel %vm3860_vm3, %v3613_v22, %v3586_v6  ;;  %v1669_v22 = vld [vmem:[%s4773_s1 + $0x20] sm:$0xff]  ;;  %vm946_vm2 = vcmask 982016  }
 0x11e   : > { %3178 = vrot.lane.b32.xlu0 %v3177_v28, %s3459_s27  ;;  %vm3893_vm8 = vcmp.ne.s32.totalorder %v591_v15, 0  ;;  %vm3907_vm10 = vcmp.ne.s32.totalorder %v801_v34, 0  ;;  %v3914_v13 = vsel %vm3880_vm6, %v538_v27, %v3662_v40  ;;  %v3919_v6 = vsel %vm3880_vm6, %v577_v26, %v3666_v41 }
 0x11f   : > { %3193 = vrot.lane.b32.xlu1 %v3192_v29, %s3460_s28  ;;  %v593_v29 = vand.u32 2, %v3681_v47 }
 0x121   : > { %vm3903_vm9 = vcmp.ne.s32.totalorder %v593_v29, 0 }
 0x122   : > { %3188 = vrot.lane.b32.xlu0 %v3187_v24, %s3459_s27 }
 0x126   : > { %3198 = vrot.lane.b32.xlu0 %v3197_v46, %s3460_s28  ;;  %v582_v46 = vand.u32 2, %v3676_v44 }
 0x128   : > { %vm3921_vm11 = vcmp.ne.s32.totalorder %v582_v46, 0 }
 0x12a   : > { %3208 = vrot.lane.b32.xlu0 %v3207_v37, %s3459_s27 }
 0x184   : > { %v3149_v61 = vpop.permute.xlu0 %3148 }
 0x185   : > { %v3164_v32 = vpop.permute.xlu1 %3163  ;;  %v3151_v20 = vunpack.i.h.bf16 %v3149_v61  ;;  %v3150_v28 = vunpack.i.l.bf16 %v3149_v61 }
 0x186   : > { %v3166_v23 = vunpack.i.h.bf16 %v3164_v32  ;;  %v3165_v38 = vunpack.i.l.bf16 %v3164_v32 }
 0x187   : > { %v784_v37 = vsel %vm737_vm4, %v3151_v20, 0.0  ;;  %v745_v5 = vsel %vm737_vm4, %v3150_v28, %v3151_v20 }
 0x188   : > { %v3159_v51 = vpop.permute.xlu0 %3158  ;;  %v856_v8 = vsel %vm3865_vm5, %v745_v5, %v3715_v16  ;;  %v857_v58 = vsel %vm3865_vm5, %v784_v37, %v3719_v17  ;;  %v788_v53 = vsel %vm737_vm4, %v3166_v23, 0.0  ;;  %v749_v15 = vsel %vm737_vm4, %v3165_v38, %v3166_v23 }
 0x189   : > { %v3174_v52 = vpop.permute.xlu1 %3173  ;;  %v3161_v61 = vunpack.i.h.bf16 %v3159_v51  ;;  %v3160_v32 = vunpack.i.l.bf16 %v3159_v51  ;;  %v3202_v17 = vpack.i.bf16 %v857_v58, %v856_v8  ;;  %v793_v5 = vand.u32 4, %v3600_v11 }
 0x18a   : > { %v3176_v34 = vunpack.i.h.bf16 %v3174_v52  ;;  %v3175_v40 = vunpack.i.l.bf16 %v3174_v52  ;;  %v583_v23 = vand.u32 2, %v3686_v50  ;;  %v3212_v51 = vpack.i.bf16 %v3919_v6, %v3914_v13 }
 0x18b   : > { %v578_v28 = vsel %vm528_vm7, %v3161_v61, 0.0  ;;  %v539_v29 = vsel %vm528_vm7, %v3160_v32, %v3161_v61  ;;  %3203 = vrot.lane.b32.xlu1 %v3202_v17, %s3461_s29  ;;  %vm3968_vm12 = vcmp.ne.s32.totalorder %v793_v5, 0 }
 0x18c   : > { %v3169_v27 = vpop.permute.xlu0 %3168  ;;  %v3933_v26 = vsel %vm3893_vm8, %v539_v29, %v3742_v25  ;;  %v3938_v24 = vsel %vm3893_vm8, %v578_v28, %v3748_v35  ;;  %v864_v25 = vsel %vm3907_vm10, %v749_v15, %v3723_v18  ;;  %v865_v35 = vsel %vm3907_vm10, %v788_v53, %v3727_v19 }
 0x18d   : > { %v3184_v41 = vpop.permute.xlu1 %3183  ;;  %v3171_v46 = vunpack.i.h.bf16 %v3169_v27  ;;  %v3170_v37 = vunpack.i.l.bf16 %v3169_v27  ;;  %v3217_v38 = vpack.i.bf16 %v3938_v24, %v3933_v26  ;;  %v569_v59 = vsel %vm528_vm7, %v3176_v34, 0.0 }
 0x18e   : > { %v3186_v8 = vunpack.i.h.bf16 %v3184_v41  ;;  %v3185_v58 = vunpack.i.l.bf16 %v3184_v41  ;;  %v530_v61 = vsel %vm528_vm7, %v3175_v40, %v3176_v34  ;;  %v795_v28 = vand.u32 4, %v3597_v10 }
 0x18f   : > { %v580_v52 = vsel %vm528_vm7, %v3171_v46, 0.0  ;;  %v541_v11 = vsel %vm528_vm7, %v3170_v37, %v3171_v46  ;;  %3218 = vrot.lane.b32.xlu0 %v3217_v38, %s3460_s28  ;;  %3213 = vrot.lane.b32.xlu1 %v3212_v51, %s3460_s28  ;;  %v3222_v34 = vpack.i.bf16 %v865_v35, %v864_v25  ;;  %vm3975_vm13 = vcmp.ne.s32.totalorder %v583_v23, 0  ;;  %v1670_v25 = vld [vmem:[%s4773_s1 + $0x28] sm:$0xff] }
 0x190   : > { %v3179_v32 = vpop.permute.xlu0 %3178  ;;  %v3961_v18 = vsel %vm3903_vm9, %v541_v11, %v3776_v54  ;;  %v3966_v19 = vsel %vm3903_vm9, %v580_v52, %v3782_v55  ;;  %v585_v55 = vand.u32 2, %v3707_v63  ;;  %v780_v20 = vsel %vm737_vm4, %v3186_v8, 0.0 }
 0x191   : > { %v3181_v16 = vunpack.i.h.bf16 %v3179_v32  ;;  %v3180_v17 = vunpack.i.l.bf16 %v3179_v32  ;;  %v3194_v53 = vpop.permute.xlu1 %3193  ;;  %v3227_v29 = vpack.i.bf16 %v3966_v19, %v3961_v18  ;;  %v741_v40 = vsel %vm737_vm4, %v3185_v58, %v3186_v8 }
 0x192   : > { %v3985_v27 = vsel %vm3921_vm11, %v530_v61, %v3754_v36  ;;  %v3990_v10 = vsel %vm3921_vm11, %v569_v59, %v3760_v39  ;;  %v3196_v37 = vunpack.i.h.bf16 %v3194_v53  ;;  %v3195_v5 = vunpack.i.l.bf16 %v3194_v53 }
 0x193   : > { %v570_v41 = vsel %vm528_vm7, %v3181_v16, 0.0  ;;  %v531_v46 = vsel %vm528_vm7, %v3180_v17, %v3181_v16  ;;  %3228 = vrot.lane.b32.xlu0 %v3227_v29, %s3460_s28  ;;  %3223 = vrot.lane.b32.xlu1 %v3222_v34, %s3461_s29  ;;  %v3232_v36 = vpack.i.bf16 %v3901_v60, %v3874_v9  ;;  %v3237_v39 = vpack.i.bf16 %v3990_v10, %v3985_v27 }
 0x194   : > { %v3189_v23 = vpop.permute.xlu0 %3188  ;;  %vm4000_vm14 = vcmp.ne.s32.totalorder %v795_v28, 0  ;;  %vm4004_vm15 = vcmp.ne.s32.totalorder %v585_v55, 0  ;;  %v796_v35 = vand.u32 4, %v3605_v14  ;;  %v848_v52 = vsel %vm3968_vm12, %v741_v40, %v3785_v56 }
 0x195   : > { %v3191_v38 = vunpack.i.h.bf16 %v3189_v23  ;;  %v3190_v51 = vunpack.i.l.bf16 %v3189_v23  ;;  %v849_v11 = vsel %vm3968_vm12, %v780_v20, %v3788_v57  ;;  %v4018_v8 = vsel %vm3975_vm13, %v531_v46, %v3803_v62 }
 0x196   : > { %v4023_v58 = vsel %vm3975_vm13, %v570_v41, %v3807_v4  ;;  %v782_v14 = vsel %vm737_vm4, %v3196_v37, 0.0  ;;  %v743_v59 = vsel %vm737_vm4, %v3195_v5, %v3196_v37  ;;  %v3247_v16 = vpack.i.bf16 %v849_v11, %v848_v52  ;;  %v1671_v52 = vld [vmem:[%s4773_s1 + $0x30] sm:$0xff]  ;;  %v1672_v11 = vld [vmem:[%s4773_s1 + $0x38] sm:$0xff] }
 0x197   : > { %v572_v56 = vsel %vm528_vm7, %v3191_v38, 0.0  ;;  %v533_v61 = vsel %vm528_vm7, %v3190_v51, %v3191_v38  ;;  %3238 = vrot.lane.b32.xlu0 %v3237_v39, %s3460_s28  ;;  %3233 = vrot.lane.b32.xlu1 %v3232_v36, %s3459_s27  ;;  %v3242_v4 = vpack.i.bf16 %v4023_v58, %v4018_v8  ;;  %v852_v17 = vsel %vm4000_vm14, %v743_v59, %v3810_v7  ;;  %v1667_v38 = vld [vmem:[%s4773_s1 + $0x10] sm:$0xff]  ;;  %v1668_v51 = vld [vmem:[%s4773_s1 + $0x18] sm:$0xff]  ;;  %s3469_s27 = smov 32  }
 0x198   : > { %v3199_v57 = vpop.permute.xlu0 %3198  ;;  %v853_v53 = vsel %vm4000_vm14, %v782_v14, %v3813_v12  ;;  %v4042_v15 = vsel %vm4004_vm15, %v533_v61, %v3824_v30  ;;  %v4047_v28 = vsel %vm4004_vm15, %v572_v56, %v3828_v31  ;;  %vm809_vm0 = vcmp.ne.s32.totalorder %v796_v35, 0  ;;  %v1673_v59 = vld [vmem:[%s4773_s1 + $0x40] sm:$0xff]  ;;  %v1674_v56 = vld [vmem:[%s4773_s1 + $0x48] sm:$0xff] }
 0x199   : > { %v3201_v62 = vunpack.i.h.bf16 %v3199_v57  ;;  %v3200_v32 = vunpack.i.l.bf16 %v3199_v57  ;;  %v589_v12 = vand.u32 2, %v3799_v33  ;;  %v3257_v55 = vpack.i.bf16 %v853_v53, %v852_v17  ;;  %v1675_v53 = vld [vmem:[%s4773_s1 + $0x50] sm:$0xff] }
 0x19a   : > { %v3252_v20 = vpack.i.bf16 %v4047_v28, %v4042_v15  ;;  %v2955_v39 = vpack.c.bf16 %v1668_v51, %v1667_v38  ;;  %v2958_v35 = vpack.c.bf16 %v1670_v25, %v1669_v22  ;;  %v2961_v14 = vpack.c.bf16 %v1672_v11, %v1671_v52 }
 0x19b   : > { %v783_v29 = vsel %vm737_vm4, %v3201_v62, 0.0  ;;  %v744_v34 = vsel %vm737_vm4, %v3200_v32, %v3201_v62  ;;  %3248 = vrot.lane.b32.xlu0 %v3247_v16, %s3461_s29  ;;  %3243 = vrot.lane.b32.xlu1 %v3242_v4, %s3460_s28  ;;  %vm602_vm1 = vcmp.ne.s32.totalorder %v589_v12, 0  ;;  %v2964_v61 = vpack.c.bf16 %v1674_v56, %v1673_v59  ;;  %v1679_v56 = vld [vmem:[%s4773_s1 + $0x70] sm:$0xff] }
 0x19c   : > { %v3209_v7 = vpop.permute.xlu0 %3208  ;;  %v854_v31 = vsel %vm809_vm0, %v744_v34, %v3838_v42  ;;  %v855_v40 = vsel %vm809_vm0, %v783_v29, %v3841_v45  ;;  %v1665_v42 = vld [vmem:[%s4773_s1] sm:$0xff]  ;;  %v1666_v45 = vld [vmem:[%s4773_s1 + $0x8] sm:$0xff]  ;;  %v799_v62 = vand.u32 4, %v3611_v21  ;;  %v800_v32 = vand.u32 4, %v3673_v43  ;;  %v1676_v29 = vld [vmem:[%s4773_s1 + $0x58] sm:$0xff] }
 0x19d   : > { %v3211_v54 = vunpack.i.h.bf16 %v3209_v7  ;;  %v3210_v30 = vunpack.i.l.bf16 %v3209_v7  ;;  %v3262_v37 = vpack.i.bf16 %v855_v40, %v854_v31  ;;  %v802_v16 = vand.u32 4, %v3681_v47 }
 0x19e   : > { %v791_v34 = vand.u32 4, %v3676_v44  ;;  %v581_v7 = vand.u32 2, %v3573_v1  ;;  %v2967_v12 = vpack.c.bf16 %v1676_v29, %v1675_v53  ;;  %vm4121_vm3 = vcmp.ne.s32.totalorder %v799_v62, 0 }
 0x19f   : > { %v576_v41 = vsel %vm528_vm7, %v3211_v54, 0.0  ;;  %v537_v46 = vsel %vm528_vm7, %v3210_v30, %v3211_v54  ;;  %3258 = vrot.lane.b32.xlu0 %v3257_v55, %s3461_s29  ;;  %3253 = vrot.lane.b32.xlu1 %v3252_v20, %s3460_s28  ;;  %vm4125_vm5 = vcmp.ne.s32.totalorder %v800_v32, 0  ;;  %vm4129_vm6 = vcmp.ne.s32.totalorder %v802_v16, 0 }
 0x1a0   : > { %v4063_v5 = vsel %vm602_vm1, %v537_v46, %v3848_v48  ;;  %v4066_v23 = vsel %vm602_vm1, %v576_v41, %v3852_v49  ;;  %v3463_v48 = vmov 0.0|0.0   ;;  %v2952_v49 = vpack.c.bf16 %v1666_v45, %v1665_v42  ;;  %v1678_v42 = vld [vmem:[%s4773_s1 + $0x68] sm:$0xff] }
 0x1a1   : > { %2951 = vmatprep.subr.bf16.mxu0 %v3463_v48  ;;  %v3272_v36 = vpack.i.bf16 %v4066_v23, %v4063_v5  ;;  %vm4141_vm8 = vcmp.ne.s32.totalorder %v791_v34, 0  ;;  %vm4145_vm9 = vcmp.ne.s32.totalorder %v581_v7, 0  ;;  %vm3464_vm10 = vmmov 0  }
 0x1a2   : > { %2953 = vmatpush3.bf16.msra.mxu0 %v2952_v49  ;;  %v792_v49 = vand.u32 4, %v3686_v50  ;;  %v3465_v55 = vmov 0.0   ;;  %vm1155_vm12 = vcmask 916480   ;;  %vm1364_vm14 = vcmask 785408  }
 0x1a3   : > { %3263 = vrot.lane.b32.xlu1 %v3262_v37, %s3462_s24  ;;  %2954 = vmatprep.subr.bf16.mxu0 %v3463_v48  ;;  %v1677_v37 = vld [vmem:[%s4773_s1 + $0x60] sm:$0xff]  ;;  %vm1865_vm0 = vcmask 261120   ;;  %vm1867_vm1 = vcmask 254976  }
 0x1a4   : > { %v2970_v51 = vpack.c.bf16 %v1678_v42, %v1677_v37  ;;  %2828 = vmatprep.mubr.msk.f32.mxu0 %vm3464_vm10, %v3465_v55  ;;  %vm4187_vm11 = vcmp.ne.s32.totalorder %v792_v49, 0 }
 0x1a6   : > { %2956 = vmatpush3.bf16.msra.mxu0 %v2955_v39 }
 0x1a7   : > { %3273 = vrot.lane.b32.xlu1 %v3272_v36, %s3460_s28  ;;  %2957 = vmatprep.subr.bf16.mxu0 %v3463_v48 }
 0x1aa   : > { %2959 = vmatpush3.bf16.msra.mxu0 %v2958_v35 }
 0x1ab   : > { %2960 = vmatprep.subr.bf16.mxu0 %v3463_v48 }
 0x1ae   : > { %2962 = vmatpush3.bf16.msra.mxu0 %v2961_v14 }
 0x1af   : > { %2963 = vmatprep.subr.bf16.mxu0 %v3463_v48 }
 0x1b2   : > { %2965 = vmatpush3.bf16.msra.mxu0 %v2964_v61 }
 0x1b3   : > { %2966 = vmatprep.subr.bf16.mxu0 %v3463_v48 }
 0x1b6   : > { %2968 = vmatpush3.bf16.msra.mxu0 %v2967_v12 }
 0x1b7   : > { %2969 = vmatprep.subr.bf16.mxu0 %v3463_v48 }
 0x1ba   : > { %2971 = vmatpush3.bf16.msra.mxu0 %v2970_v51  ;;  %v794_v51 = vand.u32 4, %v3707_v63 }
 0x1bb   : > { %2972 = vmatprep.subr.bf16.mxu0 %v3463_v48 }
 0x1fd   : > { %v3204_v57 = vpop.permute.xlu1 %3203 }
 0x1fe   : > { %v3206_v4 = vunpack.i.h.bf16 %v3204_v57  ;;  %v3205_v17 = vunpack.i.l.bf16 %v3204_v57 }
 0x200   : > { %v993_v21 = vsel %vm946_vm2, %v3206_v4, 0.0  ;;  %v954_v43 = vsel %vm946_vm2, %v3205_v17, %v3206_v4 }
 0x201   : > { %v3219_v47 = vpop.permute.xlu0 %3218  ;;  %v3214_v54 = vpop.permute.xlu1 %3213  ;;  %v3267_v30 = vpack.i.bf16 %v993_v21, %v954_v43 }
 0x202   : > { %v3221_v31 = vunpack.i.h.bf16 %v3219_v47  ;;  %v3220_v40 = vunpack.i.l.bf16 %v3219_v47  ;;  %v3216_v41 = vunpack.i.h.bf16 %v3214_v54  ;;  %v3215_v46 = vunpack.i.l.bf16 %v3214_v54 }
 0x203   : > { %3268 = vrot.lane.b32.xlu0 %v3267_v30, %s3462_s24 }
 0x204   : > { %v787_v36 = vsel %vm737_vm4, %v3221_v31, 0.0  ;;  %v748_v39 = vsel %vm737_vm4, %v3220_v40, %v3221_v31  ;;  %v786_v22 = vsel %vm737_vm4, %v3216_v41, 0.0  ;;  %v747_v25 = vsel %vm737_vm4, %v3215_v46, %v3216_v41 }
 0x205   : > { %v3229_v35 = vpop.permute.xlu0 %3228  ;;  %v3224_v52 = vpop.permute.xlu1 %3223  ;;  %v860_v11 = vsel %vm4121_vm3, %v747_v25, %v3914_v13  ;;  %v861_v14 = vsel %vm4121_vm3, %v786_v22, %v3919_v6  ;;  %v862_v50 = vsel %vm4125_vm5, %v748_v39, %v3933_v26  ;;  %v863_v59 = vsel %vm4125_vm5, %v787_v36, %v3938_v24  ;;  %v1680_v13 = vld [vmem:[%s4773_s1 + $0x78] sm:$0xff] }
 0x206   : > { %v3231_v61 = vunpack.i.h.bf16 %v3229_v35  ;;  %v3230_v57 = vunpack.i.l.bf16 %v3229_v35  ;;  %v3226_v6 = vunpack.i.h.bf16 %v3224_v52  ;;  %v3225_v62 = vunpack.i.l.bf16 %v3224_v52 }
 0x207   : > { %v3277_v26 = vpack.i.bf16 %v861_v14, %v860_v11  ;;  %v3282_v32 = vpack.i.bf16 %v863_v59, %v862_v50  ;;  %v2973_v16 = vpack.c.bf16 %v1680_v13, %v1679_v56  ;;  %vm1883_vm3 = vcmask 257024  }
 0x208   : > { %v789_v24 = vsel %vm737_vm4, %v3231_v61, 0.0  ;;  %v750_v4 = vsel %vm737_vm4, %v3230_v57, %v3231_v61  ;;  %v997_v17 = vsel %vm946_vm2, %v3226_v6, 0.0  ;;  %v958_v53 = vsel %vm946_vm2, %v3225_v62, %v3226_v6 }
 0x209   : > { %3278 = vrot.lane.b32.xlu0 %v3277_v26, %s3461_s29  ;;  %3283 = vrot.lane.b32.xlu1 %v3282_v32, %s3462_s24  ;;  %v3239_v29 = vpop.permute.xlu0 %3238  ;;  %v3234_v34 = vpop.permute.xlu1 %3233  ;;  %v3287_v7 = vpack.i.bf16 %v997_v17, %v958_v53  ;;  %v866_v12 = vsel %vm4129_vm6, %v750_v4, %v3961_v18  ;;  %v867_v21 = vsel %vm4129_vm6, %v789_v24, %v3966_v19  ;;  %vm1914_vm5 = vcmask 261124  }
 0x20a   : > { %v3241_v43 = vunpack.i.h.bf16 %v3239_v29  ;;  %v3240_v47 = vunpack.i.l.bf16 %v3239_v29  ;;  %v3236_v54 = vunpack.i.h.bf16 %v3234_v34  ;;  %v3235_v30 = vunpack.i.l.bf16 %v3234_v34  ;;  %2974 = vmatpush3.bf16.msra.mxu0 %v2973_v16 }
 0x20b   : > { %v3292_v20 = vpack.i.bf16 %v867_v21, %v866_v12  ;;  %3043 = vmatprep.subr.bf16.mxu0 %v3463_v48  ;;  %v798_v34 = vand.u32 4, %v3799_v33  ;;  %vm1916_vm6 = vcmask 259072  }
 0x20c   : > { %v778_v18 = vsel %vm737_vm4, %v3241_v43, 0.0  ;;  %v739_v19 = vsel %vm737_vm4, %v3240_v47, %v3241_v43  ;;  %v568_v44 = vsel %vm528_vm7, %v3236_v54, 0.0  ;;  %v529_v40 = vsel %vm528_vm7, %v3235_v30, %v3236_v54 }
 0x20d   : > { %3288 = vrot.lane.b32.xlu0 %v3287_v7, %s3462_s24  ;;  %3293 = vrot.lane.b32.xlu1 %v3292_v20, %s3466_s23  ;;  %v3249_v41 = vpop.permute.xlu0 %3248  ;;  %v3244_v46 = vpop.permute.xlu1 %3243  ;;  %v844_v37 = vsel %vm4141_vm8, %v739_v19, %v3985_v27  ;;  %v845_v42 = vsel %vm4141_vm8, %v778_v18, %v3990_v10  ;;  %v4207_v49 = vsel %vm4145_vm9, %v529_v40, %v3874_v9  ;;  %vm4225_vm7 = vcmp.ne.s32.totalorder %v794_v51, 0 }
 0x20e   : > { %v3251_v36 = vunpack.i.h.bf16 %v3249_v41  ;;  %v3250_v39 = vunpack.i.l.bf16 %v3249_v41  ;;  %v3246_v22 = vunpack.i.h.bf16 %v3244_v46  ;;  %v3245_v25 = vunpack.i.l.bf16 %v3244_v46 }
 0x20f   : > { %v3302_v35 = vpack.i.bf16 %v845_v42, %v844_v37  ;;  %v634_v27 = vsel %vm4145_vm9, %v568_v44, %v3901_v60  ;;  %vm811_vm13 = vcmp.ne.s32.totalorder %v798_v34, 0  ;;  %vm1947_vm8 = vcmask 261126  }
 0x210   : > { %v989_v52 = vsel %vm946_vm2, %v3251_v36, 0.0  ;;  %v779_v10 = vsel %vm737_vm4, %v3246_v22, 0.0  ;;  %v740_v45 = vsel %vm737_vm4, %v3245_v25, %v3246_v22  ;;  %v3297_v9 = vpack.i.bf16 %v634_v27, %v4207_v49 }
 0x211   : > { %3303 = vrot.lane.b32.xlu1 %v3302_v35, %s3461_s29  ;;  %v3259_v63 = vpop.permute.xlu0 %3258  ;;  %v3254_v11 = vpop.permute.xlu1 %3253  ;;  %v950_v14 = vsel %vm946_vm2, %v3250_v39, %v3251_v36  ;;  %v846_v50 = vsel %vm4187_vm11, %v740_v45, %v4018_v8  ;;  %v847_v60 = vsel %vm4187_vm11, %v779_v10, %v4023_v58  ;;  %vm4347_vm9 = vcmp.lt.s32.totalorder %v339_v0, 32  ;;  %s332_s29 = scalar_lea.vmem [#allocation5], %s4690_s22 }
 0x212   : > { %3298 = vrot.lane.b32.xlu0 %v3297_v9, %s3460_s28  ;;  %v3261_v59 = vunpack.i.h.bf16 %v3259_v63  ;;  %v3260_v56 = vunpack.i.l.bf16 %v3259_v63  ;;  %v3256_v13 = vunpack.i.h.bf16 %v3254_v11  ;;  %v3255_v61 = vunpack.i.l.bf16 %v3254_v11  ;;  %s3467_s28 = smov 64  }
 0x213   : > { %v3312_v57 = vpack.i.bf16 %v989_v52, %v950_v14  ;;  %v3307_v6 = vpack.i.bf16 %v847_v60, %v846_v50  ;;  %v790_v14 = vand.u32 4, %v3573_v1  ;;  %vm1910_vm11 = vcmp.ge.s32.totalorder %v339_v0, 32 }
 0x214   : > { %v991_v62 = vsel %vm946_vm2, %v3261_v59, 0.0  ;;  %v781_v8 = vsel %vm737_vm4, %v3256_v13, 0.0  ;;  %v742_v26 = vsel %vm737_vm4, %v3255_v61, %v3256_v13  ;;  %v952_v58 = vsel %vm946_vm2, %v3260_v56, %v3261_v59 }
 0x215   : > { %3313 = vrot.lane.b32.xlu1 %v3312_v57, %s3462_s24  ;;  %v3264_v32 = vpop.permute.xlu1 %3263  ;;  %v3322_v16 = vpack.i.bf16 %v991_v62, %v952_v58  ;;  %v850_v24 = vsel %vm4225_vm7, %v742_v26, %v4042_v15  ;;  %v851_v4 = vsel %vm4225_vm7, %v781_v8, %v4047_v28  ;;  %vm803_vm15 = vcmp.ne.s32.totalorder %v790_v14, 0 }
 0x216   : > { %3308 = vrot.lane.b32.xlu0 %v3307_v6, %s3462_s24  ;;  %v3266_v17 = vunpack.i.h.bf16 %v3264_v32  ;;  %v3265_v53 = vunpack.i.l.bf16 %v3264_v32  ;;  %v3317_v29 = vpack.i.bf16 %v851_v4, %v850_v24  ;;  %vm1911_vm7 = vcmp.lt.s32.totalorder %v339_v0, 64  ;;  %s4782_s24 = sshll.u32 %s3543_s13, 4 }
 0x217   : > { %s4700_s26 = scalar_lea.hbm %s4781_s9, %s4782_s24 }
 0x218   : > { %v1201_v7 = vsel %vm1155_vm12, %v3266_v17, 0.0  ;;  %v1162_v12 = vsel %vm1155_vm12, %v3265_v53, %v3266_v17 }
 0x219   : > { %3323 = vrot.lane.b32.xlu1 %v3322_v16, %s3466_s23  ;;  %v3274_v21 = vpop.permute.xlu1 %3273  ;;  %v3327_v47 = vpack.i.bf16 %v1201_v7, %v1162_v12 }
 0x21a   : > { %3318 = vrot.lane.b32.xlu0 %v3317_v29, %s3466_s23  ;;  %v3276_v15 = vunpack.i.h.bf16 %v3274_v21  ;;  %v3275_v43 = vunpack.i.l.bf16 %v3274_v21 }
 0x21c   : > { %v785_v28 = vsel %vm737_vm4, %v3276_v15, 0.0  ;;  %v746_v54 = vsel %vm737_vm4, %v3275_v43, %v3276_v15 }
 0x21d   : > { %v858_v30 = vsel %vm811_vm13, %v746_v54, %v4063_v5  ;;  %v859_v33 = vsel %vm811_vm13, %v785_v28, %v4066_v23  ;;  %vm4520_vm13 = vcmp.ge.s32.totalorder %v339_v0, 64 }
 0x21e   : > { %3328 = vrot.lane.b32.xlu0 %v3327_v47, %s3466_s23  ;;  %v3337_v20 = vpack.i.bf16 %v859_v33, %v858_v30 }
 0x222   : > { %3338 = vrot.lane.b32.xlu0 %v3337_v20, %s3467_s28 }
 0x275   : > { %v3269_v31 = vpop.permute.xlu0 %3268 }
 0x276   : > { %v3271_v18 = vunpack.i.h.bf16 %v3269_v31  ;;  %v3270_v19 = vunpack.i.l.bf16 %v3269_v31 }
 0x278   : > { %v1202_v44 = vsel %vm1155_vm12, %v3271_v18, 0.0  ;;  %v1163_v40 = vsel %vm1155_vm12, %v3270_v19, %v3271_v18 }
 0x279   : > { %v3332_v41 = vpack.i.bf16 %v1202_v44, %v1163_v40 }
 0x27b   : > { %v3279_v46 = vpop.permute.xlu0 %3278  ;;  %v3284_v37 = vpop.permute.xlu1 %3283  ;;  %3333 = vrot.lane.b32.xlu1 %v3332_v41, %s3466_s23 }
 0x27c   : > { %v3281_v5 = vunpack.i.h.bf16 %v3279_v46  ;;  %v3280_v23 = vunpack.i.l.bf16 %v3279_v46  ;;  %v3286_v42 = vunpack.i.h.bf16 %v3284_v37  ;;  %v3285_v51 = vunpack.i.l.bf16 %v3284_v37 }
 0x27e   : > { %v995_v36 = vsel %vm946_vm2, %v3281_v5, 0.0  ;;  %v1205_v39 = vsel %vm1155_vm12, %v3286_v42, 0.0  ;;  %v956_v22 = vsel %vm946_vm2, %v3280_v23, %v3281_v5  ;;  %v1166_v25 = vsel %vm1155_vm12, %v3285_v51, %v3286_v42 }
 0x27f   : > { %v3289_v35 = vpop.permute.xlu0 %3288  ;;  %v3294_v27 = vpop.permute.xlu1 %3293  ;;  %v3342_v52 = vpack.i.bf16 %v995_v36, %v956_v22  ;;  %v3347_v10 = vpack.i.bf16 %v1205_v39, %v1166_v25 }
 0x280   : > { %v3291_v45 = vunpack.i.h.bf16 %v3289_v35  ;;  %v3290_v9 = vunpack.i.l.bf16 %v3289_v35  ;;  %v3296_v63 = vunpack.i.h.bf16 %v3294_v27  ;;  %v3295_v11 = vunpack.i.l.bf16 %v3294_v27 }
 0x281   : > { %3343 = vrot.lane.b32.xlu1 %v3342_v52, %s3467_s28  ;;  %3348 = vrot.lane.b32.xlu0 %v3347_v10, %s3467_s28 }
 0x282   : > { %v1206_v50 = vsel %vm1155_vm12, %v3291_v45, 0.0  ;;  %v1416_v60 = vsel %vm1364_vm14, %v3296_v63, 0.0  ;;  %v1167_v38 = vsel %vm1155_vm12, %v3290_v9, %v3291_v45  ;;  %v1377_v59 = vsel %vm1364_vm14, %v3295_v11, %v3296_v63 }
 0x283   : > { %v3352_v56 = vpack.i.bf16 %v1206_v50, %v1167_v38  ;;  %v3357_v13 = vpack.i.bf16 %v1416_v60, %v1377_v59  ;;  %v3304_v57 = vpop.permute.xlu1 %3303  ;;  %v4312_v60 = vld [vmem:[%s4774_s2] ss:$0 sm:$0xff] }
 0x284   : > { %v3299_v61 = vpop.permute.xlu0 %3298  ;;  %v3306_v26 = vunpack.i.h.bf16 %v3304_v57  ;;  %v3305_v58 = vunpack.i.l.bf16 %v3304_v57 }
 0x285   : > { %v3301_v6 = vunpack.i.h.bf16 %v3299_v61  ;;  %v3300_v62 = vunpack.i.l.bf16 %v3299_v61  ;;  %3353 = vrot.lane.b32.xlu1 %v3352_v56, %s3467_s28  ;;  %3358 = vrot.lane.b32.xlu0 %v3357_v13, %s3467_s28  ;;  %v4318_v13 = vld [vmem:[%s4774_s2 + $0x1] ss:$0 sm:$0xff] }
 0x286   : > { %v948_v17 = vsel %vm946_vm2, %v3305_v58, %v3306_v26  ;;  %v4325_v26 = vld [vmem:[%s4774_s2 + $0x2] ss:$0 sm:$0xff]  ;;  %vm1881_vm2 = vcmask 261122  }
 0x287   : > { %v738_v8 = vsel %vm737_vm4, %v3300_v62, %v3301_v6  ;;  %v3314_v53 = vpop.permute.xlu1 %3313  ;;  %vm1573_vm4 = vcmask 523264  }
 0x288   : > { %v842_v32 = vsel %vm803_vm15, %v738_v8, %v4207_v49  ;;  %v3309_v16 = vpop.permute.xlu0 %3308  ;;  %v3316_v29 = vunpack.i.h.bf16 %v3314_v53  ;;  %v3315_v34 = vunpack.i.l.bf16 %v3314_v53 }
 0x289   : > { %2829 = vmatmul.mubr.f32.vlgmr.msra.gmra.mrb[0].mxu0 %v842_v32  ;;  %v3311_v24 = vunpack.i.h.bf16 %v3309_v16  ;;  %v3310_v4 = vunpack.i.l.bf16 %v3309_v16 }
 0x28a   : > { %2831 = vmatprep.mubr.msk.f32.mxu0 %vm3464_vm10, %v3465_v55  ;;  %v1159_v15 = vsel %vm1155_vm12, %v3315_v34, %v3316_v29 }
 0x28b   : > { %v1158_v7 = vsel %vm1155_vm12, %v3310_v4, %v3311_v24  ;;  %v3324_v43 = vpop.permute.xlu1 %3323  ;;  %vm4513_vm12 = vmand %vm1910_vm11, %vm1911_vm7 }
 0x28c   : > { %v3319_v12 = vpop.permute.xlu0 %3318  ;;  %v3326_v47 = vunpack.i.h.bf16 %v3324_v43  ;;  %v3325_v28 = vunpack.i.l.bf16 %v3324_v43 }
 0x28d   : > { %2832 = vmatmul.mubr.f32.gmra.mrb[2].mxu0 %v948_v17  ;;  %v3321_v49 = vunpack.i.h.bf16 %v3319_v12  ;;  %v3320_v21 = vunpack.i.l.bf16 %v3319_v12 }
 0x28e   : > { %2834 = vmatprep.mubr.msk.f32.mxu0 %vm3464_vm10, %v3465_v55  ;;  %v1370_v31 = vsel %vm1364_vm14, %v3325_v28, %v3326_v47 }
 0x28f   : > { %v1369_v54 = vsel %vm1364_vm14, %v3320_v21, %v3321_v49 }
 0x290   : > { %v3329_v30 = vpop.permute.xlu0 %3328 }
 0x291   : > { %2835 = vmatmul.mubr.f32.gmra.mrb[4].mxu0 %v1158_v7  ;;  %v3331_v33 = vunpack.i.h.bf16 %v3329_v30  ;;  %v3330_v20 = vunpack.i.l.bf16 %v3329_v30 }
 0x292   : > { %2837 = vmatprep.mubr.msk.f32.mxu0 %vm3464_vm10, %v3465_v55 }
 0x293   : > { %v1371_v18 = vsel %vm1364_vm14, %v3330_v20, %v3331_v33 }
 0x294   : > { %v3339_v19 = vpop.permute.xlu0 %3338 }
 0x295   : > { %2838 = vmatmul.mubr.f32.gmra.mrb[6].mxu0 %v1159_v15  ;;  %v3341_v46 = vunpack.i.h.bf16 %v3339_v19  ;;  %v3340_v37 = vunpack.i.l.bf16 %v3339_v19 }
 0x296   : > { %2840 = vmatprep.mubr.msk.f32.mxu0 %vm3464_vm10, %v3465_v55 }
 0x297   : > { %v1582_v36 = vsel %vm1573_vm4, %v3340_v37, %v3341_v46 }
 0x299   : > { %2841 = vmatmul.mubr.f32.gmra.mrb[8].mxu0 %v1369_v54 }
 0x29a   : > { %2843 = vmatprep.mubr.msk.f32.mxu0 %vm3464_vm10, %v3465_v55 }
 0x29d   : > { %2844 = vmatmul.mubr.f32.gmra.mrb[10].mxu0 %v1370_v31 }
 0x29e   : > { %2846 = vmatprep.mubr.msk.f32.mxu0 %vm3464_vm10, %v3465_v55 }
 0x2a1   : > { %2847 = vmatmul.mubr.f32.gmra.mrb[12].mxu0 %v1371_v18 }
 0x2a2   : > { %2849 = vmatprep.mubr.msk.f32.mxu0 %vm3464_vm10, %v3465_v55 }
 0x2ed   : > { %v3334_v44 = vpop.permute.xlu1 %3333 }
 0x2ee   : > { %v3336_v40 = vunpack.i.h.bf16 %v3334_v44  ;;  %v3335_v41 = vunpack.i.l.bf16 %v3334_v44 }
 0x2f0   : > { %v1372_v5 = vsel %vm1364_vm14, %v3335_v41, %v3336_v40  ;;  %vm4525_vm14 = vcmp.lt.s32.totalorder %v339_v0, 96 }
 0x2f1   : > { %2850 = vmatmul.mubr.f32.gmra.mrb[14].mxu0 %v1372_v5  ;;  %vm1945_vm15 = vmand %vm4520_vm13, %vm4525_vm14 }
 0x2f2   : > { %2852 = vmatprep.mubr.msk.f32.mxu0 %vm3464_vm10, %v3465_v55 }
 0x2f3   : > { %v3344_v23 = vpop.permute.xlu1 %3343  ;;  %v3349_v39 = vpop.permute.xlu0 %3348 }
 0x2f4   : > { %v3346_v42 = vunpack.i.h.bf16 %v3344_v23  ;;  %v3345_v51 = vunpack.i.l.bf16 %v3344_v23  ;;  %v3351_v22 = vunpack.i.h.bf16 %v3349_v39  ;;  %v3350_v25 = vunpack.i.l.bf16 %v3349_v39 }
 0x2f5   : > { %2853 = vmatmul.mubr.f32.gmra.mrb[16].mxu0 %v1582_v36  ;;  %v3468_v23 = vmov 1966171168  }
 0x2f6   : > { %2855 = vmatprep.mubr.msk.f32.mxu0 %vm3464_vm10, %v3465_v55  ;;  %v1583_v35 = vsel %vm1573_vm4, %v3345_v51, %v3346_v42  ;;  %v1584_v45 = vsel %vm1573_vm4, %v3350_v25, %v3351_v22  ;;  %v1894_v42 = vunpack.c.l.s4 %v3468_v23 }
 0x2f7   : > { %v3354_v27 = vpop.permute.xlu1 %3353  ;;  %v3359_v9 = vpop.permute.xlu0 %3358 }
 0x2f8   : > { %v3356_v52 = vunpack.i.h.bf16 %v3354_v27  ;;  %v3355_v10 = vunpack.i.l.bf16 %v3354_v27  ;;  %v3361_v63 = vunpack.i.h.bf16 %v3359_v9  ;;  %v3360_v11 = vunpack.i.l.bf16 %v3359_v9 }
 0x2f9   : > { %2856 = vmatmul.mubr.f32.gmra.mrb[18].mxu0 %v1583_v35 }
 0x2fa   : > { %2858 = vmatprep.mubr.msk.f32.mxu0 %vm3464_vm10, %v3465_v55  ;;  %v1585_v14 = vsel %vm1573_vm4, %v3355_v10, %v3356_v52  ;;  %v1586_v50 = vsel %vm1573_vm4, %v3360_v11, %v3361_v63 }
 0x2fd   : > { %2859 = vmatmul.mubr.f32.gmra.mrb[20].mxu0 %v1584_v45 }
 0x2fe   : > { %2861 = vmatprep.mubr.msk.f32.mxu0 %vm3464_vm10, %v3465_v55 }
 0x301   : > { %2862 = vmatmul.mubr.f32.gmra.mrb[22].mxu0 %v1585_v14 }
 0x302   : > { %2864 = vmatprep.mubr.msk.f32.mxu0 %vm3464_vm10, %v3465_v55 }
 0x305   : > { %2865 = vmatmul.mubr.f32.gmra.mrb[24].mxu0 %v1586_v50 }
 0x306   : > { %2937 = vmatprep.mubr.msk.f32.mxu0 %vm3464_vm10, %v3465_v55 }
 0x35c   : > { %v1752_v38 = vpop.f32.mrb[0].mxu0 }
 0x35d   : > { %v1753_v59 = vadd.f32 %v4312_v60, %v1752_v38  ;;  %v2830_v56 = vpop.f32.mrb[1].mxu0  ;;  %v1895_v38 = vunpack.c.0.s8 %v1894_v42 }
 0x35f   : > { %v1816_v61 = vmax.f32 %v1753_v59, 0.0 }
 0x360   : > { %v1757_v57 = vpop.f32.mrb[2].mxu0 }
 0x361   : > { %v1834_v6 = vmul.f32 %v4318_v13, %v1816_v61  ;;  %v1758_v62 = vadd.f32 %v4312_v60, %v1757_v57  ;;  %v2833_v8 = vpop.f32.mrb[3].mxu0 }
 0x363   : > { %v1817_v58 = vmax.f32 %v1758_v62, 0.0  ;;  %v1852_v16 = vadd.f32 %v4325_v26, %v1834_v6 }
 0x364   : > { %v1762_v32 = vpop.f32.mrb[4].mxu0 }
 0x365   : > { %v1835_v24 = vmul.f32 %v4318_v13, %v1817_v58  ;;  %v1763_v4 = vadd.f32 %v4312_v60, %v1762_v32  ;;  %v2836_v17 = vpop.f32.mrb[5].mxu0  ;;  %v1866_v7 = vsel %vm1865_vm0, %v1852_v16, -inf }
 0x367   : > { %v1853_v53 = vadd.f32 %v4325_v26, %v1835_v24  ;;  %v1818_v29 = vmax.f32 %v1763_v4, 0.0 }
 0x368   : > { %v1767_v34 = vpop.f32.mrb[6].mxu0 }
 0x369   : > { %v1868_v12 = vsel %vm1867_vm1, %v1853_v53, -inf  ;;  %v1836_v49 = vmul.f32 %v4318_v13, %v1818_v29  ;;  %v1768_v21 = vadd.f32 %v4312_v60, %v1767_v34  ;;  %v2839_v15 = vpop.f32.mrb[7].mxu0  ;;  %v1882_v33 = vsel %vm1881_vm2, %v1853_v53, -inf }
 0x36a   : > { %v1869_v43 = vmax.f32 %v1866_v7, %v1868_v12  ;;  %v4356_v53 = vsub.s32 %v1895_v38, %v3573_v1 }
 0x36b   : > { %v1854_v47 = vadd.f32 %v4325_v26, %v1836_v49  ;;  %v1819_v28 = vmax.f32 %v1768_v21, 0.0 }
 0x36c   : > { %v1870_v54 = vrot.slane %v1869_v43, 4  ;;  %v1772_v30 = vpop.f32.mrb[8].mxu0 }
 0x36d   : > { %v1884_v20 = vsel %vm1883_vm3, %v1854_v47, -inf  ;;  %v1837_v31 = vmul.f32 %v4318_v13, %v1819_v28  ;;  %v1773_v18 = vadd.f32 %v4312_v60, %v1772_v30  ;;  %v2842_v19 = vpop.f32.mrb[9].mxu0  ;;  %v1915_v36 = vsel %vm1914_vm5, %v1854_v47, -inf  ;;  %v2129_v47 = vld [vmem:[%s4775_s3 + $0x88] sm:$0xff]  ;;  %v2112_v28 = vld [vmem:[%s4775_s3] sm:$0xff] }
 0x36e   : > { %v1885_v44 = vmax.f32 %v1882_v33, %v1884_v20  ;;  %v1871_v40 = vmax.f32 %v1869_v43, %v1870_v54  ;;  %v2128_v43 = vld [vmem:[%s4775_s3 + $0x80] sm:$0xff] }
 0x36f   : > { %v1855_v41 = vadd.f32 %v4325_v26, %v1837_v31  ;;  %v1820_v46 = vmax.f32 %v1773_v18, 0.0  ;;  %v2975_v20 = vpack.c.bf16 %v2129_v47, %v2128_v43  ;;  %v2113_v31 = vld [vmem:[%s4775_s3 + $0x8] sm:$0xff] }
 0x370   : > { %v1886_v37 = vrot.slane %v1885_v44, 4  ;;  %v1777_v5 = vpop.f32.mrb[10].mxu0  ;;  %v1872_v51 = vrot.slane %v1871_v40, 2 }
 0x371   : > { %v1917_v39 = vsel %vm1916_vm6, %v1855_v41, -inf  ;;  %v1838_v22 = vmul.f32 %v4318_v13, %v1820_v46  ;;  %v1778_v25 = vadd.f32 %v4312_v60, %v1777_v5  ;;  %v2845_v35 = vpop.f32.mrb[11].mxu0  ;;  %v1948_v56 = vsel %vm1947_vm8, %v1855_v41, -inf  ;;  %2976 = vmatprep.subr.bf16.mxu1 %v2975_v20  ;;  %v2114_v20 = vld [vmem:[%s4775_s3 + $0x10] sm:$0xff] }
 0x372   : > { %v1887_v27 = vmax.f32 %v1885_v44, %v1886_v37  ;;  %v1918_v52 = vmax.f32 %v1915_v36, %v1917_v39  ;;  %v1873_v10 = vmax.f32 %v1871_v40, %v1872_v51  ;;  %v2977_v44 = vpack.c.bf16 %v2113_v31, %v2112_v28 }
 0x373   : > { %v1856_v45 = vadd.f32 %v4325_v26, %v1838_v22  ;;  %v1821_v9 = vmax.f32 %v1778_v25, 0.0 }
 0x374   : > { %v1919_v11 = vrot.slane %v1918_v52, 4  ;;  %v1782_v14 = vpop.f32.mrb[12].mxu0  ;;  %v1888_v50 = vrot.slane %v1887_v27, 2  ;;  %v1874_v59 = vrot.slane %v1873_v10, 1  ;;  %2978 = vmatpush3.bf16.msra.mxu1 %v2977_v44 }
 0x375   : > { %v1949_v61 = vsel %vm1865_vm0, %v1856_v45, -inf  ;;  %v1839_v57 = vmul.f32 %v4318_v13, %v1821_v9  ;;  %v1783_v6 = vadd.f32 %v4312_v60, %v1782_v14  ;;  %v2848_v62 = vpop.f32.mrb[13].mxu0 }
 0x376   : > { %v1920_v8 = vmax.f32 %v1918_v52, %v1919_v11  ;;  %v1950_v58 = vmax.f32 %v1948_v56, %v1949_v61  ;;  %v1889_v32 = vmax.f32 %v1887_v27, %v1888_v50  ;;  %v1875_v16 = vmax.f32 %v1873_v10, %v1874_v59 }
 0x377   : > { %v1822_v24 = vmax.f32 %v1783_v6, 0.0  ;;  %v1857_v34 = vadd.f32 %v4325_v26, %v1839_v57 }
 0x378   : > { %v1951_v4 = vrot.slane %v1950_v58, 4  ;;  %v1890_v17 = vrot.slane %v1889_v32, 1  ;;  %v1921_v29 = vrot.slane %v1920_v8, 2  ;;  %1880 = vst.msk [vmem:[#allocation2] sm:$0x1] %vm4347_vm9, %v1875_v16 }
 0x379   : > { %v1840_v7 = vmul.f32 %v4318_v13, %v1822_v24  ;;  %v1979_v18 = vsel %vm1865_vm0, %v1857_v34, -inf }
 0x37a   : > { %v1952_v12 = vmax.f32 %v1950_v58, %v1951_v4  ;;  %v1891_v49 = vmax.f32 %v1889_v32, %v1890_v17  ;;  %v1922_v21 = vmax.f32 %v1920_v8, %v1921_v29 }
 0x37b   : > { %v1858_v15 = vadd.f32 %v4325_v26, %v1840_v7 }
 0x37c   : > { %v1899_v54 = vrot.slane %v1891_v49, %v4356_v53  ;;  %v1923_v30 = vrot.slane %v1922_v21, 1  ;;  %v1953_v33 = vrot.slane %v1952_v12, 2 }
 0x37d   : > { %v1980_v19 = vsel %vm1867_vm1, %v1858_v15, -inf  ;;  %v1989_v62 = vsel %vm1881_vm2, %v1858_v15, -inf }
 0x37e   : > { %v1981_v40 = vmax.f32 %v1979_v18, %v1980_v19  ;;  %v1906_v41 = vrot.slane %v1899_v54, %v4356_v53  ;;  %v1924_v46 = vmax.f32 %v1922_v21, %v1923_v30  ;;  %v1954_v37 = vmax.f32 %v1952_v12, %v1953_v33  ;;  %v2130_v30 = vld [vmem:[%s4775_s3 + $0x90] sm:$0xff]  ;;  %v2131_v33 = vld [vmem:[%s4775_s3 + $0x98] sm:$0xff] }
 0x380   : > { %v1982_v5 = vrot.slane %v1981_v40, 4  ;;  %1907 = vrot.lane.b32.xlu1 %v1906_v41, %s3469_s27  ;;  %v1932_v23 = vrot.slane %v1924_v46, %v4356_v53  ;;  %v1955_v42 = vrot.slane %v1954_v37, 1  ;;  %v2115_v41 = vld [vmem:[%s4775_s3 + $0x18] sm:$0xff] }
 0x382   : > { %v1939_v51 = vrot.slane %v1932_v23, %v4356_v53  ;;  %v1956_v36 = vmax.f32 %v1954_v37, %v1955_v42  ;;  %v1983_v39 = vmax.f32 %v1981_v40, %v1982_v5  ;;  %v2979_v40 = vpack.c.bf16 %v2131_v33, %v2130_v30 }
 0x383   : > { %v2981_v42 = vpack.c.bf16 %v2115_v41, %v2114_v20 }
 0x384   : > { %1940 = vrot.lane.b32.xlu1 %v1939_v51, %s3467_s28  ;;  %v1964_v22 = vrot.slane %v1956_v36, %v4356_v53  ;;  %v1984_v25 = vrot.slane %v1983_v39, 2  ;;  %2980 = vmatprep.subr.bf16.mxu1 %v2979_v40 }
 0x385   : > { %2982 = vmatpush3.bf16.msra.mxu1 %v2981_v42 }
 0x386   : > { %v1971_v35 = vrot.slane %v1964_v22, %v4356_v53  ;;  %v1985_v27 = vmax.f32 %v1983_v39, %v1984_v25  ;;  %v2132_v25 = vld [vmem:[%s4775_s3 + $0xa0] sm:$0xff] }
 0x388   : > { %1972 = vrot.lane.b32.xlu1 %v1971_v35, %s3466_s23  ;;  %v1986_v52 = vrot.slane %v1985_v27, 1  ;;  %v2133_v35 = vld [vmem:[%s4775_s3 + $0xa8] sm:$0xff] }
 0x38a   : > { %v1987_v10 = vmax.f32 %v1985_v27, %v1986_v52  ;;  %v2116_v27 = vld [vmem:[%s4775_s3 + $0x20] sm:$0xff] }
 0x38c   : > { %1988 = vst.msk [vmem:[#allocation2 + $0x1] sm:$0x1] %vm4347_vm9, %v1987_v10 }
 0x3c4   : > { %v1787_v45 = vpop.f32.mrb[14].mxu0 }
 0x3c5   : > { %v1788_v9 = vadd.f32 %v4312_v60, %v1787_v45  ;;  %v2851_v11 = vpop.f32.mrb[15].mxu0 }
 0x3c6   : > { %v2983_v11 = vpack.c.bf16 %v2133_v35, %v2132_v25 }
 0x3c7   : > { %v1823_v14 = vmax.f32 %v1788_v9, 0.0 }
 0x3c8   : > { %v1792_v50 = vpop.f32.mrb[16].mxu0  ;;  %2984 = vmatprep.subr.bf16.mxu1 %v2983_v11  ;;  %v2140_v11 = vld [vmem:[%s4775_s3 + $0xe0] sm:$0xff] }
 0x3c9   : > { %v1841_v38 = vmul.f32 %v4318_v13, %v1823_v14  ;;  %v1793_v59 = vadd.f32 %v4312_v60, %v1792_v50  ;;  %v2854_v56 = vpop.f32.mrb[17].mxu0  ;;  %v2117_v14 = vld [vmem:[%s4775_s3 + $0x28] sm:$0xff] }
 0x3cb   : > { %v1859_v61 = vadd.f32 %v4325_v26, %v1841_v38  ;;  %v1824_v57 = vmax.f32 %v1793_v59, 0.0 }
 0x3cc   : > { %v1797_v6 = vpop.f32.mrb[18].mxu0 }
 0x3cd   : > { %v1990_v8 = vsel %vm1883_vm3, %v1859_v61, -inf  ;;  %v1842_v58 = vmul.f32 %v4318_v13, %v1824_v57  ;;  %v1798_v32 = vadd.f32 %v4312_v60, %v1797_v6  ;;  %v2857_v16 = vpop.f32.mrb[19].mxu0  ;;  %v2017_v7 = vsel %vm1914_vm5, %v1859_v61, -inf }
 0x3ce   : > { %v1991_v24 = vmax.f32 %v1989_v62, %v1990_v8  ;;  %v2985_v61 = vpack.c.bf16 %v2117_v14, %v2116_v27  ;;  %v2135_v16 = vld [vmem:[%s4775_s3 + $0xb8] sm:$0xff]  ;;  %v2141_v14 = vld [vmem:[%s4775_s3 + $0xe8] sm:$0xff] }
 0x3cf   : > { %v1860_v4 = vadd.f32 %v4325_v26, %v1842_v58  ;;  %v1825_v17 = vmax.f32 %v1798_v32, 0.0  ;;  %v2134_v32 = vld [vmem:[%s4775_s3 + $0xb0] sm:$0xff] }
 0x3d0   : > { %v1992_v29 = vrot.slane %v1991_v24, 4  ;;  %v1802_v34 = vpop.f32.mrb[20].mxu0  ;;  %2986 = vmatpush3.bf16.msra.mxu1 %v2985_v61  ;;  %v2125_v61 = vld [vmem:[%s4775_s3 + $0x68] sm:$0xff] }
 0x3d1   : > { %v2018_v12 = vsel %vm1916_vm6, %v1860_v4, -inf  ;;  %v1843_v49 = vmul.f32 %v4318_v13, %v1825_v17  ;;  %v1803_v21 = vadd.f32 %v4312_v60, %v1802_v34  ;;  %v2860_v15 = vpop.f32.mrb[21].mxu0  ;;  %v2045_v18 = vsel %vm1947_vm8, %v1860_v4, -inf  ;;  %v2119_v34 = vld [vmem:[%s4775_s3 + $0x38] sm:$0xff] }
 0x3d2   : > { %v1993_v43 = vmax.f32 %v1991_v24, %v1992_v29  ;;  %v2019_v47 = vmax.f32 %v2017_v7, %v2018_v12  ;;  %v2987_v29 = vpack.c.bf16 %v2135_v16, %v2134_v32  ;;  %v2136_v7 = vld [vmem:[%s4775_s3 + $0xc0] sm:$0xff]  ;;  %v2137_v12 = vld [vmem:[%s4775_s3 + $0xc8] sm:$0xff]  ;;  %v2127_v32 = vld [vmem:[%s4775_s3 + $0x78] sm:$0xff] }
 0x3d3   : > { %v1861_v28 = vadd.f32 %v4325_v26, %v1843_v49  ;;  %v1826_v54 = vmax.f32 %v1803_v21, 0.0 }
 0x3d4   : > { %v2020_v31 = vrot.slane %v2019_v47, 4  ;;  %v1807_v19 = vpop.f32.mrb[22].mxu0  ;;  %v1994_v44 = vrot.slane %v1993_v43, 2  ;;  %2988 = vmatprep.subr.bf16.mxu1 %v2987_v29  ;;  %v2405_v29 = vld [vmem:[%s4777_s5 + $0x30] sm:$0xff] }
 0x3d5   : > { %v2046_v46 = vsel %vm1865_vm0, %v1861_v28, -inf  ;;  %v1844_v37 = vmul.f32 %v4318_v13, %v1826_v54  ;;  %v1808_v5 = vadd.f32 %v4312_v60, %v1807_v19  ;;  %v2863_v23 = vpop.f32.mrb[23].mxu0  ;;  %v2121_v28 = vld [vmem:[%s4775_s3 + $0x48] sm:$0xff]  ;;  %v2138_v54 = vld [vmem:[%s4775_s3 + $0xd0] sm:$0xff]  ;;  %v2991_v19 = vpack.c.bf16 %v2137_v12, %v2136_v7 }
 0x3d6   : > { %v2021_v51 = vmax.f32 %v2019_v47, %v2020_v31  ;;  %v2047_v36 = vmax.f32 %v2045_v18, %v2046_v46  ;;  %v1995_v39 = vmax.f32 %v1993_v43, %v1994_v44  ;;  %v2120_v47 = vld [vmem:[%s4775_s3 + $0x40] sm:$0xff]  ;;  %v2123_v23 = vld [vmem:[%s4775_s3 + $0x58] sm:$0xff] }
 0x3d7   : > { %v1827_v22 = vmax.f32 %v1808_v5, 0.0  ;;  %v1862_v50 = vadd.f32 %v4325_v26, %v1844_v37  ;;  %v2993_v44 = vpack.c.bf16 %v2121_v28, %v2120_v47  ;;  %v2122_v5 = vld [vmem:[%s4775_s3 + $0x50] sm:$0xff] }
 0x3d8   : > { %v2048_v52 = vrot.slane %v2047_v36, 4  ;;  %v1812_v10 = vpop.f32.mrb[24].mxu0  ;;  %v1996_v45 = vrot.slane %v1995_v39, 1  ;;  %v2022_v9 = vrot.slane %v2021_v51, 2  ;;  %v2997_v25 = vpack.c.bf16 %v2123_v23, %v2122_v5  ;;  %v2311_v5 = vld [vmem:[%s4776_s4] sm:$0xff]  ;;  %v2312_v23 = vld [vmem:[%s4776_s4 + $0x8] sm:$0xff] }
 0x3d9   : > { %v1845_v38 = vmul.f32 %v4318_v13, %v1827_v22  ;;  %v1813_v59 = vadd.f32 %v4312_v60, %v1812_v10  ;;  %v2866_v56 = vpop.f32.mrb[25].mxu0  ;;  %v2118_v60 = vld [vmem:[%s4775_s3 + $0x30] sm:$0xff]  ;;  %v2073_v49 = vsel %vm1865_vm0, %v1862_v50, -inf  ;;  %v2124_v50 = vld [vmem:[%s4775_s3 + $0x60] sm:$0xff] }
 0x3da   : > { %v2049_v57 = vmax.f32 %v2047_v36, %v2048_v52  ;;  %v1997_v6 = vmax.f32 %v1995_v39, %v1996_v45  ;;  %v2023_v62 = vmax.f32 %v2021_v51, %v2022_v9  ;;  %v2989_v43 = vpack.c.bf16 %v2119_v34, %v2118_v60 }
 0x3db   : > { %v1863_v8 = vadd.f32 %v4325_v26, %v1845_v38  ;;  %v1828_v58 = vmax.f32 %v1813_v59, 0.0  ;;  %v2999_v56 = vpack.c.bf16 %v2141_v14, %v2140_v11  ;;  %v2321_v11 = vld [vmem:[%s4776_s4 + $0x50] sm:$0xff]  ;;  %v2322_v14 = vld [vmem:[%s4776_s4 + $0x58] sm:$0xff] }
 0x3dc   : > { %v2005_v24 = vrot.slane %v1997_v6, %v4356_v53  ;;  %v2024_v4 = vrot.slane %v2023_v62, 1  ;;  %v2050_v17 = vrot.slane %v2049_v57, 2  ;;  %2990 = vmatpush3.bf16.msra.mxu1 %v2989_v43  ;;  %v2143_v6 = vld [vmem:[%s4775_s3 + $0xf8] sm:$0xff] }
 0x3dd   : > { %v2074_v21 = vsel %vm1867_vm1, %v1863_v8, -inf  ;;  %v1846_v15 = vmul.f32 %v4318_v13, %v1828_v58  ;;  %v2139_v13 = vld [vmem:[%s4775_s3 + $0xd8] sm:$0xff]  ;;  %2992 = vmatprep.subr.bf16.mxu1 %v2991_v19  ;;  %v2126_v58 = vld [vmem:[%s4775_s3 + $0x70] sm:$0xff]  ;;  %vm1975_vm1 = vcmp.ge.s32.totalorder %v339_v0, 96 }
 0x3de   : > { %v2075_v30 = vmax.f32 %v2073_v49, %v2074_v21  ;;  %v2012_v33 = vrot.slane %v2005_v24, %v4356_v53  ;;  %v2025_v20 = vmax.f32 %v2023_v62, %v2024_v4  ;;  %v2051_v31 = vmax.f32 %v2049_v57, %v2050_v17  ;;  %v2142_v57 = vld [vmem:[%s4775_s3 + $0xf0] sm:$0xff] }
 0x3df   : > { %v1864_v18 = vadd.f32 %v4325_v26, %v1846_v15  ;;  %v2995_v37 = vpack.c.bf16 %v2139_v13, %v2138_v54  ;;  %v2083_v26 = vsel %vm1881_vm2, %v1863_v8, -inf  ;;  %v3001_v62 = vpack.c.bf16 %v2125_v61, %v2124_v50  ;;  %v2145_v54 = vld [vmem:[%s4775_s3 + $0x108] sm:$0xff]  ;;  %v2146_v13 = vld [vmem:[%s4775_s3 + $0x110] sm:$0xff] }
 0x3e0   : > { %v2076_v40 = vrot.slane %v2075_v30, 4  ;;  %2013 = vrot.lane.b32.xlu0 %v2012_v33, %s3469_s27  ;;  %v2033_v41 = vrot.slane %v2025_v20, %v4356_v53  ;;  %v2052_v46 = vrot.slane %v2051_v31, 1  ;;  %2994 = vmatpush3.bf16.msra.mxu1 %v2993_v44  ;;  %v3003_v8 = vpack.c.bf16 %v2143_v6, %v2142_v57  ;;  %v2325_v61 = vld [vmem:[%s4776_s4 + $0x70] sm:$0xff]  ;;  %v2326_v57 = vld [vmem:[%s4776_s4 + $0x78] sm:$0xff] }
 0x3e1   : > { %v2084_v42 = vsel %vm1883_vm3, %v1864_v18, -inf  ;;  %2996 = vmatprep.subr.bf16.mxu1 %v2995_v37  ;;  %v3005_v24 = vpack.c.bf16 %v2127_v32, %v2126_v58  ;;  %vm1976_vm2 = vcmp.lt.s32.totalorder %v339_v0, 128  ;;  %v2144_v0 = vld [vmem:[%s4775_s3 + $0x100] sm:$0xff]  ;;  %v2147_v18 = vld [vmem:[%s4775_s3 + $0x118] sm:$0xff]  ;;  %v2164_v37 = vsub.s32 2, %v3573_v1  ;;  %v2401_v58 = vld [vmem:[%s4777_s5 + $0x10] sm:$0xff] }
 0x3e2   : > { %v2085_v51 = vmax.f32 %v2083_v26, %v2084_v42  ;;  %v2040_v36 = vrot.slane %v2033_v41, %v4356_v53  ;;  %v2053_v39 = vmax.f32 %v2051_v31, %v2052_v46  ;;  %v2077_v22 = vmax.f32 %v2075_v30, %v2076_v40  ;;  %vm1977_vm3 = vmand %vm1975_vm1, %vm1976_vm2  ;;  %v2150_v40 = vld [vmem:[%s4775_s3 + $0x130] sm:$0xff]  ;;  %v2151_v41 = vld [vmem:[%s4775_s3 + $0x138] sm:$0xff] }
 0x3e3   : > { %v3008_v31 = vpack.c.bf16 %v2145_v54, %v2144_v0  ;;  %v3011_v19 = vpack.c.bf16 %v2147_v18, %v2146_v13  ;;  %v3017_v46 = vpack.c.bf16 %v2151_v41, %v2150_v40  ;;  %v3020_v26 = vpack.c.bf16 %v2312_v23, %v2311_v5  ;;  %v2314_v1 = vld [vmem:[%s4776_s4 + $0x18] sm:$0xff]  ;;  %v2482_v0 = vld [vmem:[%s4778_s6] sm:$0xff]  ;;  %v2483_v54 = vld [vmem:[%s4778_s6 + $0x8] sm:$0xff] }
 0x3e4   : > { %v2086_v35 = vrot.slane %v2085_v51, 4  ;;  %2041 = vrot.lane.b32.xlu0 %v2040_v36, %s3467_s28  ;;  %v2061_v27 = vrot.slane %v2053_v39, %v4356_v53  ;;  %v2078_v52 = vrot.slane %v2077_v22, 2  ;;  %2998 = vmatpush3.bf16.msra.mxu1 %v2997_v25  ;;  %v2315_v39 = vld [vmem:[%s4776_s4 + $0x20] sm:$0xff]  ;;  %v3035_v50 = vpack.c.bf16 %v2322_v14, %v2321_v11  ;;  %v2484_v18 = vld [vmem:[%s4778_s6 + $0x10] sm:$0xff] }
 0x3e5   : > { %3000 = vmatprep.subr.bf16.mxu1 %v2999_v56  ;;  %v3041_v6 = vpack.c.bf16 %v2326_v57, %v2325_v61 }
 0x3e6   : > { %v2087_v10 = vmax.f32 %v2085_v51, %v2086_v35  ;;  %v2068_v45 = vrot.slane %v2061_v27, %v4356_v53  ;;  %v2079_v9 = vmax.f32 %v2077_v22, %v2078_v52  ;;  %v2313_v51 = vld [vmem:[%s4776_s4 + $0x10] sm:$0xff]  ;;  %v2316_v22 = vld [vmem:[%s4776_s4 + $0x28] sm:$0xff]  ;;  %v2318_v27 = vld [vmem:[%s4776_s4 + $0x38] sm:$0xff] }
 0x3e7   : > { %v3023_v36 = vpack.c.bf16 %v2314_v1, %v2313_v51  ;;  %v3026_v25 = vpack.c.bf16 %v2316_v22, %v2315_v39  ;;  %v2317_v35 = vld [vmem:[%s4776_s4 + $0x30] sm:$0xff]  ;;  %v2319_v52 = vld [vmem:[%s4776_s4 + $0x40] sm:$0xff] }
 0x3e8   : > { %2069 = vrot.lane.b32.xlu0 %v2068_v45, %s3466_s23  ;;  %v2088_v38 = vrot.slane %v2087_v10, 2  ;;  %v2080_v59 = vrot.slane %v2079_v9, 1  ;;  %3002 = vmatpush3.bf16.msra.mxu1 %v3001_v62  ;;  %v2320_v45 = vld [vmem:[%s4776_s4 + $0x48] sm:$0xff]  ;;  %v2399_v62 = vld [vmem:[%s4777_s5] sm:$0xff] }
 0x3e9   : > { %3004 = vmatprep.subr.bf16.mxu1 %v3003_v8  ;;  %v2400_v8 = vld [vmem:[%s4777_s5 + $0x8] sm:$0xff] }
 0x3ea   : > { %v2089_v16 = vmax.f32 %v2087_v10, %v2088_v38  ;;  %v2081_v60 = vmax.f32 %v2079_v9, %v2080_v59  ;;  %v3029_v10 = vpack.c.bf16 %v2318_v27, %v2317_v35  ;;  %v3032_v9 = vpack.c.bf16 %v2320_v45, %v2319_v52  ;;  %v2323_v38 = vld [vmem:[%s4776_s4 + $0x60] sm:$0xff]  ;;  %v2324_v59 = vld [vmem:[%s4776_s4 + $0x68] sm:$0xff] }
 0x3eb   : > { %v3038_v56 = vpack.c.bf16 %v2324_v59, %v2323_v38  ;;  %v3044_v32 = vpack.c.bf16 %v2400_v8, %v2399_v62 }
 0x3ec   : > { %v2090_v4 = vrot.slane %v2089_v16, 1  ;;  %2082 = vst.msk [vmem:[#allocation2 + $0x2] sm:$0x1] %vm4347_vm9, %v2081_v60  ;;  %3006 = vmatpush3.bf16.msra.mxu1 %v3005_v24  ;;  %v2403_v24 = vld [vmem:[%s4777_s5 + $0x20] sm:$0xff] }
 0x3ed   : > { %3007 = vmatprep.subr.bf16.mxu1 %v3463_v48  ;;  %3045 = vmatpush3.bf16.msra.mxu0 %v3044_v32 }
 0x3ee   : > { %v2091_v17 = vmax.f32 %v2089_v16, %v2090_v4  ;;  %v2402_v16 = vld [vmem:[%s4777_s5 + $0x18] sm:$0xff]  ;;  %3046 = vmatprep.subr.bf16.mxu0 %v3463_v48  ;;  %v2404_v4 = vld [vmem:[%s4777_s5 + $0x28] sm:$0xff] }
 0x3ef   : > { %v3047_v60 = vpack.c.bf16 %v2402_v16, %v2401_v58 }
 0x3f0   : > { %v2099_v34 = vrot.slane %v2091_v17, %v4356_v53  ;;  %v3050_v17 = vpack.c.bf16 %v2404_v4, %v2403_v24 }
 0x3f1   : > { %3048 = vmatpush3.bf16.msra.mxu0 %v3047_v60 }
 0x3f2   : > { %v1908_v12 = vpop.permute.xlu1 %1907  ;;  %v2106_v49 = vrot.slane %v2099_v34, %v4356_v53  ;;  %3049 = vmatprep.subr.bf16.mxu0 %v3463_v48  ;;  %v2406_v34 = vld [vmem:[%s4777_s5 + $0x38] sm:$0xff] }
 0x3f3   : > { %1913 = vst.msk [vmem:[#allocation2] sm:$0x1] %vm4513_vm12, %v1908_v12  ;;  %v3053_v7 = vpack.c.bf16 %v2406_v34, %v2405_v29 }
 0x3f4   : > { %2107 = vrot.lane.b32.xlu1 %v2106_v49, %s3469_s27  ;;  %s2594_s27 = sshll.u32 %s332_s29, 4  ;;  %s2595_s27 = int_to_ptr.vmem [resolvable:$true] %s2594_s27 }
 0x3f5   : > { %3051 = vmatpush3.bf16.msra.mxu0 %v3050_v17  ;;  %s3362_s28 = scalar_lea.vmem %s2595_s27, 16  ;;  %p3369_p0 = scmp.lt.s32.totalorder %s2595_s27, %s3367_s17 }
 0x3f6   : > { %v1941_v21 = vpop.permute.xlu1 %1940  ;;  %3052 = vmatprep.subr.bf16.mxu0 %v3463_v48  ;;  %p3363_p11 = scmp.ne.s32.totalorder %s2595_s27, %s3362_s28  ;;  %p3370_p1 = scmp.lt.s32.totalorder %s3368_s21, %s3362_s28 }
 0x3f7   : > { %1946 = vst.msk [vmem:[#allocation2] sm:$0x1] %vm1945_vm15, %v1941_v21  ;;  %v2152_v21 = vld [vmem:[%s4779_s7] sm:$0x1] }
 0x3f8   : > { %p3364_p12 = pnand %p3363_p11, %p3560_p5  ;;  %p3371_p2 = por %p3370_p1, %p3369_p0 }
 0x3f9   : > { %3054 = vmatpush3.bf16.msra.mxu0 %v3053_v7 }
 0x3fa   : > { %v1973_v15 = vpop.permute.xlu1 %1972  ;;  %p3365_p13 = pneg %p3364_p12 }
 0x3fb   : > { %1978 = vst.msk [vmem:[#allocation2] sm:$0x1] %vm1977_vm3, %v1973_v15 }
 0x3fc   : > { %p3372_p3 = pnand %p3371_p2, %p3365_p13 }
 0x452   : > { %v2014_v53 = vpop.permute.xlu0 %2013 }
 0x453   : > { %2016 = vst.msk [vmem:[#allocation2 + $0x1] sm:$0x1] %vm4513_vm12, %v2014_v53 }
 0x456   : > { %v2042_v43 = vpop.permute.xlu0 %2041 }
 0x457   : > { %2044 = vst.msk [vmem:[#allocation2 + $0x1] sm:$0x1] %vm1945_vm15, %v2042_v43 }
 0x45a   : > { %v2070_v47 = vpop.permute.xlu0 %2069 }
 0x45b   : > { %2072 = vst.msk [vmem:[#allocation2 + $0x1] sm:$0x1] %vm1977_vm3, %v2070_v47 }
 0x466   : > { %v2108_v28 = vpop.permute.xlu1 %2107 }
 0x467   : > { %2110 = vst.msk [vmem:[#allocation2 + $0x2] sm:$0x1] %vm4513_vm12, %v2108_v28 }
 0x46e   : > { %v2111_v30 = vld [vmem:[#allocation2] sm:$0x7] }
 0x46f   : > { %v2161_v33 = vrot.slane %v2111_v30, %v345_v3  ;;  %v2157_v20 = vrot.slane %v2111_v30, %v341_v2  ;;  %v2148_v2 = vld [vmem:[%s4775_s3 + $0x120] sm:$0xff]  ;;  %v2149_v3 = vld [vmem:[%s4775_s3 + $0x128] sm:$0xff]  ;;  %v2165_v42 = vrot.slane %v2111_v30, %v2164_v37  ;;  %v3056_v30 = vpack.c.bf16 %v2483_v54, %v2482_v0 }
 0x470   : > { %v3014_v44 = vpack.c.bf16 %v2149_v3, %v2148_v2  ;;  %v2407_v2 = vld [vmem:[%s4779_s7 + $0x2] sm:$0x1] }
 0x471   : > { %2234 = vmatprep.mubr.f32.mxu1 %v2161_v33  ;;  %v2327_v33 = vld [vmem:[%s4779_s7 + $0x1] sm:$0x1] }
 0x472   : > { %2235 = vmatmul.mubr.f32.vlgmr.msra.gmra.mrb[0].mxu1 %v2157_v20 }
 0x473   : > { %3009 = vmatpush3.bf16.msra.mxu1 %v3008_v31  ;;  %2883 = vmatprep.mubr.msk.f32.mxu1 %vm3464_vm10, %v3465_v55 }
 0x474   : > { %3010 = vmatprep.subr.bf16.mxu1 %v3463_v48 }
 0x477   : > { %3012 = vmatpush3.bf16.msra.mxu1 %v3011_v19 }
 0x478   : > { %3013 = vmatprep.subr.bf16.mxu1 %v3463_v48 }
 0x47b   : > { %3015 = vmatpush3.bf16.msra.mxu1 %v3014_v44 }
 0x47c   : > { %3016 = vmatprep.subr.bf16.mxu1 %v3463_v48 }
 0x47f   : > { %3018 = vmatpush3.bf16.msra.mxu1 %v3017_v46 }
 0x480   : > { %3019 = vmatprep.subr.bf16.mxu1 %v3463_v48 }
 0x482   : > { %2884 = vmatmul.mubr.msk.f32.vlgmr.msra.gmra.mrb[2].mxu1 %vm1573_vm4, %v2165_v42 }
 0x483   : > { %3021 = vmatpush3.bf16.msra.mxu1 %v3020_v26  ;;  %2918 = vmatprep.mubr.msk.f32.mxu1 %vm3464_vm10, %v3465_v55 }
 0x484   : > { %3022 = vmatprep.subr.bf16.mxu1 %v3463_v48 }
 0x487   : > { %3024 = vmatpush3.bf16.msra.mxu1 %v3023_v36 }
 0x488   : > { %3025 = vmatprep.subr.bf16.mxu1 %v3463_v48 }
 0x48b   : > { %3027 = vmatpush3.bf16.msra.mxu1 %v3026_v25 }
 0x48c   : > { %3028 = vmatprep.subr.bf16.mxu1 %v3463_v48 }
 0x48f   : > { %3030 = vmatpush3.bf16.msra.mxu1 %v3029_v10 }
 0x490   : > { %3031 = vmatprep.subr.bf16.mxu1 %v3463_v48 }
 0x493   : > { %3033 = vmatpush3.bf16.msra.mxu1 %v3032_v9 }
 0x494   : > { %3034 = vmatprep.subr.bf16.mxu1 %v3463_v48 }
 0x497   : > { %3036 = vmatpush3.bf16.msra.mxu1 %v3035_v50 }
 0x498   : > { %3037 = vmatprep.subr.bf16.mxu1 %v3463_v48 }
 0x49b   : > { %3039 = vmatpush3.bf16.msra.mxu1 %v3038_v56 }
 0x49c   : > { %3040 = vmatprep.subr.bf16.mxu1 %v3463_v48 }
 0x49f   : > { %3042 = vmatpush3.bf16.msra.mxu1 %v3041_v6 }
 0x4a0   : > { %3055 = vmatprep.subr.bf16.mxu1 %v3463_v48 }
 0x545   : > { %v2753_v63 = vpop.f32.mrb[0].mxu1 }
 0x546   : > { %v2754_v12 = vpop.f32.mrb[1].mxu1 }
 0x547   : > { %v2755_v49 = vadd.f32 %v2754_v12, %v2753_v63 }
 0x549   : > { %v2237_v15 = vadd.f32 %v2755_v49, %v2152_v21 }
 0x555   : > { %v2306_v53 = vpop.f32.mrb[2].mxu1 }
 0x556   : > { %v2307_v43 = vadd.f32 %v2306_v53, %v2237_v15  ;;  %v2885_v47 = vpop.f32.mrb[3].mxu1 }
 0x558   : > { %v2310_v28 = vmax.f32 %v2307_v43, 0.0 }
 0x55a   : > { %2919 = vmatmul.mubr.f32.vlgmr.msra.gmra.mrb[4].mxu1 %v2310_v28 }
 0x55b   : > { %2948 = vmatprep.mubr.msk.f32.mxu1 %vm3464_vm10, %v3465_v55  ;;  %3057 = vmatpush3.bf16.msra.mxu1 %v3056_v30  ;;  %vm2562_vm10 = vcmask 253952  }
 0x55c   : > { %3058 = vmatprep.subr.bf16.mxu1 %v3463_v48  ;;  %v2485_v48 = vld [vmem:[%s4778_s6 + $0x18] sm:$0xff] }
 0x55d   : > { %v3059_v19 = vpack.c.bf16 %v2485_v48, %v2484_v18 }
 0x55f   : > { %3060 = vmatpush3.bf16.msra.mxu1 %v3059_v19 }
 0x62d   : > { %v2394_v20 = vpop.f32.mrb[4].mxu1 }
 0x62e   : > { %v2395_v31 = vadd.f32 %v2394_v20, %v2327_v33  ;;  %v2920_v55 = vpop.f32.mrb[5].mxu1 }
 0x630   : > { %v2398_v13 = vmax.f32 %v2395_v31, 0.0 }
 0x632   : > { %2938 = vmatmul.mubr.msk.f32.vlgmr.msra.gmra.mrb[26].mxu0 %vm1573_vm4, %v2398_v13 }
 0x705   : > { %v2477_v3 = vpop.f32.mrb[26].mxu0 }
 0x706   : > { %v2478_v44 = vadd.f32 %v2477_v3, %v2407_v2  ;;  %v2939_v40 = vpop.f32.mrb[27].mxu0 }
 0x708   : > { %v2481_v41 = vmax.f32 %v2478_v44, 0.0 }
 0x70a   : > { %2949 = vmatmul.mubr.msk.f32.vlgmr.msra.gmra.mrb[6].mxu1 %vm1865_vm0, %v2481_v41  ;;  %2563 = vst.msk [vmem:[%s332_s29] sm:$0x1] %vm2562_vm10, %v2481_v41 }
 0x70b   : > { %3375 = shalt.err (!%p3372_p3)
}
 0x70c   : > { %s3376_s29 = scalar_lea.hbm %s4700_s26, 16  ;;  %s3380_s16 = scalar_lea.hbm %s4781_s9, 32 }
 0x70d   : > { %p3377_p4 = scmp.ne.s32.totalorder %s4700_s26, %s3376_s29  ;;  %p3381_p9 = scmp.lt.u32.totalorder %s4700_s26, %s4781_s9 }
 0x70e   : > { %p3382_p10 = scmp.lt.u32.totalorder %s3380_s16, %s3376_s29  ;;  %p3384_p12 = scmp.lt.u32.totalorder %s3376_s29, %s4700_s26 }
 0x70f   : > { %p3378_p7 = pnand %p3377_p4, %p3560_p5 }
 0x710   : > { %p3383_p11 = por %p3382_p10, %p3381_p9 }
 0x711   : > { %p3379_p8 = pneg %p3378_p7 }
 0x712   : > { %p3385_p13 = por %p3384_p12, %p3383_p11 }
 0x714   : > { %p3386_p0 = pnand %p3385_p13, %p3379_p8 }
 0x716   : > { %3389 = shalt.err (!%p3386_p0)
}
 0x717   : > { %3062 = dma.vmem_to_hbm [thread:$0]  (%p3560_p5), %s2595_s27, 16, %s4700_s26, %s2569_s14   ;;  %v2486_v46 = vld [vmem:[%s4779_s7 + $0x3] sm:$0x1]  ;;  %vm2560_vm4 = vcmask 24576  }
 0x718   : > { %s326_s24 = scalar_lea.vmem [#allocation3], %s4690_s22  ;;  %s4839_s29 = sshll.u32 %s3543_s13, 4 }
 0x719   : > { %s2581_s25 = sshll.u32 %s326_s24, 4  ;;  %s4729_s17 = scalar_lea.hbm %s4780_s8, %s4839_s29  ;;  %s4731_s25 = int_to_ptr.vmem [resolvable:$true] %s2581_s25 }
 0x71a   : > { %s2565_s26 = scalar_lea.sflag [#allocation4], %s4690_s22  ;;  %s3390_s27 = scalar_lea.vmem %s4731_s25, 16 }
 0x71b   : > { %p3391_p1 = scmp.ne.s32.totalorder %s4731_s25, %s3390_s27  ;;  %s3471_s14 = smov [#allocation3]  }
 0x71c   : > { %s3394_s28 = sshll.u32 %s3471_s14, 4  ;;  %s3395_s28 = int_to_ptr.vmem [resolvable:$false] %s3394_s28 }
 0x71d   : > { %p3392_p2 = pnand %p3391_p1, %p3560_p5  ;;  %s3396_s13 = scalar_lea.vmem %s3395_s28, 32 }
 0x71e   : > { %p3397_p4 = scmp.lt.s32.totalorder %s4731_s25, %s3395_s28  ;;  %p3398_p7 = scmp.lt.s32.totalorder %s3396_s13, %s3390_s27 }
 0x71f   : > { %p3393_p3 = pneg %p3392_p2 }
 0x720   : > { %p3399_p8 = por %p3398_p7, %p3397_p4 }
 0x722   : > { %p3400_p9 = pnand %p3399_p8, %p3393_p3 }
 0x7dd   : > { %v2556_v37 = vpop.f32.mrb[6].mxu1 }
 0x7de   : > { %v2557_v5 = vadd.f32 %v2556_v37, %v2486_v46  ;;  %v2950_v23 = vpop.f32.mrb[7].mxu1 }
 0x7e0   : > { %2561 = vst.msk [vmem:[%s326_s24] sm:$0x1] %vm2560_vm4, %v2557_v5 }
 0x7e1   : > { %3403 = shalt.err (!%p3400_p9)
}
 0x7e2   : > { %s3404_s22 = scalar_lea.hbm %s4729_s17, 16  ;;  %s3408_s29 = scalar_lea.hbm %s4780_s8, 32 }
 0x7e3   : > { %p3405_p10 = scmp.ne.s32.totalorder %s4729_s17, %s3404_s22  ;;  %p3409_p13 = scmp.lt.u32.totalorder %s4729_s17, %s4780_s8 }
 0x7e4   : > { %p3410_p0 = scmp.lt.u32.totalorder %s3408_s29, %s3404_s22  ;;  %p3412_p2 = scmp.lt.u32.totalorder %s3404_s22, %s4729_s17 }
 0x7e5   : > { %p3406_p11 = pnand %p3405_p10, %p3560_p5 }
 0x7e6   : > { %p3411_p1 = por %p3410_p0, %p3409_p13 }
 0x7e7   : > { %p3407_p12 = pneg %p3406_p11 }
 0x7e8   : > { %p3413_p3 = por %p3412_p2, %p3411_p1 }
 0x7ea   : > { %p3414_p4 = pnand %p3413_p3, %p3407_p12 }
 0x7ec   : > { %3417 = shalt.err (!%p3414_p4)
}
 0x7ed   : > { %3061 = dma.vmem_to_hbm [thread:$0]  (%p3560_p5), %s4731_s25, 16, %s4729_s17, %s2565_s26  }
 0x7ee PF: > { %p3072_p7 = scmp.ge.s32.totalorder %s3456_s12, 2  ;;  %s2606_s27 = sand.u32 1, %s3444_s30  }
 0x7ef   : > { %s2607_s14 = scalar_lea.sflag [#allocation4], %s2606_s27 }
 0x7f0   : > { %p3066_p8 = pnand %p3072_p7, %p3564_p6 }
 0x7f2   : > { %3435 = dma.done.wait (!%p3066_p8), %s2607_s14, 16  }
 0x7f3   : > { %3437 = vsyncadd (!%p3066_p8), %s2607_s14, 4294967280  ;;  %s2615_s28 = scalar_lea.sflag [#allocation6], %s2606_s27 }
 0x7f4   : > { %3439 = dma.done.wait (!%p3066_p8), %s2615_s28, 16  }
 0x7f5   : > { %3441 = vsyncadd (!%p3066_p8), %s2615_s28, 4294967280  ;;  %p23_p5 = scmp.ge.s32.totalorder %s3547_s15, 4   ;;  %s4840_s30 = smov %s3448_s10 }
 0x7f6   : > { %s4841_s10 = smov %s3452_s11  ;;  %s4842_s11 = smov %s3558_s18 }
 0x7f7   : > { %s4843_s12 = smov %s3547_s15  ;;  %25 = sbr.rel (!%p23_p5) target bundleno = 5 (0x5), region = 104 }
 0x7fe   :  { %2619 = vsyncpa [#allocation4], 1 }
 0x7ff   :  { %2621 = vsyncpa [#allocation4 + $0x1], 1 }
 0x800   :  { %2622 = vsyncpa [#allocation6], 1 }
 0x801   :  { %2624 = vsyncpa [#allocation6 + $0x1], 1 }

</bundles_post_ra>
